<compile_context>
chip_gen: v7x
topology: tpu7x:2x2x1
jax: 0.10.0
libtpu: 0.0.40
codegen_flags: <defaults>
</compile_context>

<pallas_src>
import functools
import math

import jax
import jax.numpy as jnp
import numpy as np
from jax.experimental import pallas as pl
from jax.experimental.pallas import tpu as pltpu


def _idiv_const(a, c):
    """Exact floor(a / c) for small non-negative int32 `a` and constant `c`,
    without relying on vector integer-division lowering."""
    return jnp.floor((a.astype(jnp.float32) + 0.5) * (1.0 / c)).astype(jnp.int32)


def _flow_reg_kernel(x_ref, out_ref, *, U, V, MD, MDF, WSIZE):
    x = x_ref[...].astype(jnp.float32)                      # (D, NT)
    D = x.shape[0]

    # Per-channel (u, v) indices as (D, 1) columns (lane-broadcast below).
    d_col = jax.lax.broadcasted_iota(jnp.int32, (D, 1), 0)
    du = _idiv_const(d_col, V)
    dv = d_col - du * V

    # Per-pixel max & argmax (lowest flat index on ties) over displacement
    # channels.
    m0 = jnp.max(x, axis=0, keepdims=True)                               # (1, NT)
    idx = jnp.min(jnp.where(x == m0, d_col, D), axis=0, keepdims=True)   # (1, NT)
    iu = _idiv_const(idx, V)
    iv = idx - iu * V

    # (2*WSIZE+1)^2 window around the argmax == one-hot scatter + MaxPool3d.
    # Unsigned range check:  |a| <= W  <=>  uint32(a + W) <= 2W.
    span = jnp.uint32(2 * WSIZE)
    mask = ((du + WSIZE - iu).astype(jnp.uint32) <= span) & (
        (dv + WSIZE - iv).astype(jnp.uint32) <= span)                    # (D, NT)

    # Shared exponentials: the global max is always inside the window so
    # t <= 0 and exp never overflows; one exp per channel per pixel.
    t = x - m0
    eg = jnp.exp(t)                        # global softmax weights, in (0, 1]
    e = jnp.where(mask, eg, 0.0)           # truncated softmax weights
    exl = e * x                            # entropy numerator pieces: sum(e*x)
    exg = eg * x                           #                           sum(eg*x)

    # Channel-constant reductions on the MXU: C rows are [ones, flowx, flowy, 0..].
    r8 = jax.lax.broadcasted_iota(jnp.int32, (8, D), 0)
    d8 = jax.lax.broadcasted_iota(jnp.int32, (8, D), 1)
    du8 = _idiv_const(d8, V)
    dv8 = d8 - du8 * V
    fx8 = (du8 - MD).astype(jnp.float32)    # varies along U, [-MD, MD]
    fy8 = (dv8 - MDF).astype(jnp.float32)   # varies along V, [-MDF, MDF]
    C = jnp.where(r8 == 0, 1.0,
                  jnp.where(r8 == 1, fx8,
                            jnp.where(r8 == 2, fy8, 0.0)))
    red = jnp.dot(C, e, preferred_element_type=jnp.float32,
                  precision=jax.lax.Precision.HIGHEST)      # (8, NT), full f32
    s = red[0:1, :]                                         # sum(e)       >= 1
    wx = red[1:2, :]                                        # sum(e*flowx)
    wy = red[2:3, :]                                        # sum(e*flowy)

    # Remaining per-pixel sums (XLU cross-sublane reduces).
    loc_num = jnp.sum(exl, axis=0, keepdims=True)           # sum(e  * x)
    sg = jnp.sum(eg, axis=0, keepdims=True)                 # sum(eg)      >= 1
    glb_num = jnp.sum(exg, axis=0, keepdims=True)           # sum(eg * x)

    inv_s = 1.0 / s                                         # one divide / pixel
    inv_sg = 1.0 / sg

    # Entropy via log p = (x - m0) - log(sum):
    #   H = log(sum) + m0 - sum(w * x) / sum
    if WSIZE == 0:
        local_ent = jnp.ones_like(s)
    else:
        local_ent = (jnp.log(s) + m0 - loc_num * inv_s) * (
            1.0 / math.log(float((2 * WSIZE + 1) ** 2)))
    global_ent = (jnp.log(sg) + m0 - glb_num * inv_sg) * (
        1.0 / math.log(float(U * V)))

    # Single lane-dense 4-sublane store: [flow_x, flow_y, local_ent, global_ent].
    out_ref[...] = jnp.concatenate(
        [wx * inv_s, wy * inv_s, local_ent, global_ent], axis=0)

    # TODO(synk): the torch NaN fallback (F.softmax on isnan entries) is not
    # replicated; with NaN costs the outputs here become NaN/inf instead.


def _vmem_capacity_bytes(default=64 << 20):
    try:
        cap = getattr(pltpu.get_tpu_info(), "vmem_capacity_bytes", None)
        if cap:
            return int(cap)
    except Exception:
        pass
    return default


def _pick_tile(N, n_tile, batch):
    """Largest multiple-of-128 divisor of N that is <= n_tile (else full N),
    shrunk a little if the total grid would be too small to pipeline / shard
    across TensorCores."""
    nt = N
    t = min(n_tile, N)
    t -= t % 128
    while t >= 128:
        if N % t == 0:
            nt = t
            break
        t -= 128
    while batch * (N // nt) < 4 and nt % 256 == 0 and nt > 512:
        nt //= 2
    return nt


def flow_reg_pallas(x, maxdisp=4, fac=1, wsize=3, ent=True, n_tile=None):
    """x: (B, U, V, H, W) float32/bfloat16 cost volume. Returns (flow, entropy|None)."""
    b, u, v, h, w = x.shape
    assert u == 2 * maxdisp + 1
    assert v == 2 * (maxdisp // fac) + 1
    D = u * v
    N = h * w

    vmem_cap = _vmem_capacity_bytes()
    if n_tile is None:
        # 8192 lanes on 128 MiB chips (v5e/v6e), 4096 on 64 MiB v7x.
        n_tile = 8192 if vmem_cap >= (96 << 20) else 4096
    nt = _pick_tile(N, n_tile, b)
    # Double-buffered input + ~5 live (D, nt) f32 temporaries need headroom
    # above the default scoped VMEM limit; stay well under physical VMEM.
    vmem_limit = int(min(max(vmem_cap - (16 << 20), 32 << 20), 100 << 20))

    x2 = x.reshape(b, D, N)
    if x2.dtype not in (jnp.float32, jnp.bfloat16):
        x2 = x2.astype(jnp.float32)

    kernel = functools.partial(
        _flow_reg_kernel, U=u, V=v, MD=maxdisp, MDF=maxdisp // fac, WSIZE=wsize)

    out = pl.pallas_call(
        kernel,
        out_shape=jax.ShapeDtypeStruct((b, 4, N), jnp.float32),
        grid_spec=pltpu.PrefetchScalarGridSpec(
            num_scalar_prefetch=0,
            grid=(N // nt, b),            # spatial tiles outermost (megacore)
            in_specs=[pl.BlockSpec((None, D, nt), lambda ni, bi: (bi, 0, ni))],
            out_specs=pl.BlockSpec((None, 4, nt), lambda ni, bi: (bi, 0, ni)),
        ),
        compiler_params=pltpu.CompilerParams(
            dimension_semantics=("parallel", "parallel"),
            vmem_limit_bytes=vmem_limit,
        ),
    )(x2)

    out = out.reshape(b, 4, h, w)
    flow = out[:, 0:2]
    if ent:
        return flow, out[:, 2:4]
    return flow, None


def flow_reg_reference(x, maxdisp=4, fac=1, wsize=3):
    """Pure-JAX reference mirroring the PyTorch forward (ent=True)."""
    b, u, v, h, w = x.shape
    D = u * v
    xf = x.reshape(b, D, h, w)
    idx = jnp.argmax(xf, axis=1)                         # (b, h, w)
    iu = idx // v
    iv = idx % v
    dd = jnp.arange(D)
    du = (dd // v)[None, :, None, None]
    dv = (dd % v)[None, :, None, None]
    mask = (jnp.abs(du - iu[:, None]) <= wsize) & (jnp.abs(dv - iv[:, None]) <= wsize)
    xm = jnp.where(mask, xf, -jnp.inf)
    p = jax.nn.softmax(xm, axis=1)
    flowx = (du - maxdisp).astype(jnp.float32)
    flowy = (dv - maxdisp // fac).astype(jnp.float32)
    outx = jnp.sum(p * flowx, axis=1, keepdims=True)
    outy = jnp.sum(p * flowy, axis=1, keepdims=True)
    flow = jnp.concatenate([outx, outy], axis=1)
    pc = jnp.clip(p, 1e-9, 1.0 - 1e-9)
    local_ent = jnp.sum(-p * jnp.log(pc), axis=1, keepdims=True) / np.log(
        float((2 * wsize + 1) ** 2))
    pg = jax.nn.softmax(xf, axis=1)
    pgc = jnp.clip(pg, 1e-9, 1.0 - 1e-9)
    global_ent = jnp.sum(-pg * jnp.log(pgc), axis=1, keepdims=True) / np.log(float(u * v))
    entropy = jnp.concatenate([local_ent, global_ent], axis=1)
    return flow, entropy


if __name__ == "__main__":
    key = jax.random.PRNGKey(0)
    B, H, W = 2, 16, 16

    for maxdisp, fac in [(4, 1), (4, 2)]:
        u = 2 * maxdisp + 1
        v = 2 * (maxdisp // fac) + 1
        key, sub = jax.random.split(key)
        x = jax.random.normal(sub, (B, u, v, H, W), dtype=jnp.float32)

        flow, entropy = flow_reg_pallas(x, maxdisp=maxdisp, fac=fac, ent=True)
        jax.block_until_ready((flow, entropy))

        flow_ref, ent_ref = flow_reg_reference(x, maxdisp=maxdisp, fac=fac)
        assert flow.shape == (B, 2, H, W) and entropy.shape == (B, 2, H, W)
        assert jnp.allclose(flow, flow_ref, atol=1e-4, rtol=1e-4), float(
            jnp.max(jnp.abs(flow - flow_ref)))
        assert jnp.allclose(entropy, ent_ref, atol=1e-4, rtol=1e-4), float(
            jnp.max(jnp.abs(entropy - ent_ref)))

    print("KERNEL_OK")
</pallas_src>

<mosaic_0001>
module attributes {stable_mosaic.version = 11 : i64} {
  func.func @_flow_reg_kernel(%arg0: i32, %arg1: i32, %arg2: memref<1x81x256xf32, #tpu.memory_space<vmem>>, %arg3: memref<1x4x256xf32, #tpu.memory_space<vmem>>) attributes {dimension_semantics = [#tpu.dimension_semantics<parallel>, #tpu.dimension_semantics<parallel>], iteration_bounds = array<i64: 1, 2>, scalar_prefetch = 0 : i64, scratch_operands = 0 : i64, tpu.core_type = #tpu.core_type<tc>, window_params = [{transform_indices = @transform_0, window_bounds = array<i64: 1, 81, 256>}, {transform_indices = @transform_1, window_bounds = array<i64: 1, 4, 256>}]} {
    %c0 = arith.constant 0 : index
    %c0_0 = arith.constant 0 : index
    %c0_1 = arith.constant 0 : index
    %0 = vector.load %arg2[%c0, %c0_0, %c0_1] : memref<1x81x256xf32, #tpu.memory_space<vmem>>, vector<1x81x256xf32>
    %1 = vector.shape_cast %0 : vector<1x81x256xf32> to vector<81x256xf32>
    %2 = tpu.iota {dimensions = array<i32: 0>} : vector<81x1xi32>
    %3 = arith.sitofp %2 : vector<81x1xi32> to vector<81x1xf32>
    %cst = arith.constant 5.000000e-01 : f32
    %4 = vector.broadcast %cst : f32 to vector<81x1xf32>
    %5 = arith.addf %3, %4 : vector<81x1xf32>
    %cst_2 = arith.constant 0.111111112 : f32
    %6 = vector.broadcast %cst_2 : f32 to vector<81x1xf32>
    %7 = arith.mulf %5, %6 : vector<81x1xf32>
    %8 = math.floor %7 : vector<81x1xf32>
    %9 = arith.fptosi %8 : vector<81x1xf32> to vector<81x1xi32>
    %c9_i32 = arith.constant 9 : i32
    %10 = vector.broadcast %c9_i32 : i32 to vector<81x1xi32>
    %11 = arith.muli %9, %10 : vector<81x1xi32>
    %12 = arith.subi %2, %11 : vector<81x1xi32>
    %cst_3 = arith.constant dense<0xFF800000> : vector<256xf32>
    %13 = vector.multi_reduction <maximumf>, %1, %cst_3 [0] : vector<81x256xf32> to vector<256xf32>
    %14 = vector.shape_cast %13 : vector<256xf32> to vector<1x256xf32>
    %15 = vector.broadcast %14 : vector<1x256xf32> to vector<81x256xf32>
    %16 = arith.cmpf oeq, %1, %15 : vector<81x256xf32>
    %c81_i32 = arith.constant 81 : i32
    %17 = vector.shape_cast %2 : vector<81x1xi32> to vector<81x1xi32>
    %18 = vector.broadcast %17 : vector<81x1xi32> to vector<81x256xi32>
    %19 = vector.broadcast %c81_i32 : i32 to vector<81x256xi32>
    %20 = arith.select %16, %18, %19 : vector<81x256xi1>, vector<81x256xi32>
    %cst_4 = arith.constant dense<2147483647> : vector<256xi32>
    %21 = vector.multi_reduction <minsi>, %20, %cst_4 [0] : vector<81x256xi32> to vector<256xi32>
    %22 = vector.shape_cast %21 : vector<256xi32> to vector<1x256xi32>
    %23 = arith.sitofp %22 : vector<1x256xi32> to vector<1x256xf32>
    %cst_5 = arith.constant 5.000000e-01 : f32
    %24 = vector.broadcast %cst_5 : f32 to vector<1x256xf32>
    %25 = arith.addf %23, %24 : vector<1x256xf32>
    %cst_6 = arith.constant 0.111111112 : f32
    %26 = vector.broadcast %cst_6 : f32 to vector<1x256xf32>
    %27 = arith.mulf %25, %26 : vector<1x256xf32>
    %28 = math.floor %27 : vector<1x256xf32>
    %29 = arith.fptosi %28 : vector<1x256xf32> to vector<1x256xi32>
    %c9_i32_7 = arith.constant 9 : i32
    %30 = vector.broadcast %c9_i32_7 : i32 to vector<1x256xi32>
    %31 = arith.muli %29, %30 : vector<1x256xi32>
    %32 = arith.subi %22, %31 : vector<1x256xi32>
    %c3_i32 = arith.constant 3 : i32
    %33 = vector.broadcast %c3_i32 : i32 to vector<81x1xi32>
    %34 = arith.addi %9, %33 : vector<81x1xi32>
    %35 = vector.broadcast %34 : vector<81x1xi32> to vector<81x256xi32>
    %36 = vector.broadcast %29 : vector<1x256xi32> to vector<81x256xi32>
    %37 = arith.subi %35, %36 : vector<81x256xi32>
    %c6_i32 = arith.constant 6 : i32
    %38 = vector.broadcast %c6_i32 : i32 to vector<81x256xi32>
    %39 = arith.cmpi ule, %37, %38 : vector<81x256xi32>
    %c3_i32_8 = arith.constant 3 : i32
    %40 = vector.broadcast %c3_i32_8 : i32 to vector<81x1xi32>
    %41 = arith.addi %12, %40 : vector<81x1xi32>
    %42 = vector.broadcast %41 : vector<81x1xi32> to vector<81x256xi32>
    %43 = vector.broadcast %32 : vector<1x256xi32> to vector<81x256xi32>
    %44 = arith.subi %42, %43 : vector<81x256xi32>
    %c6_i32_9 = arith.constant 6 : i32
    %45 = vector.broadcast %c6_i32_9 : i32 to vector<81x256xi32>
    %46 = arith.cmpi ule, %44, %45 : vector<81x256xi32>
    %47 = arith.andi %39, %46 : vector<81x256xi1>
    %48 = vector.broadcast %14 : vector<1x256xf32> to vector<81x256xf32>
    %49 = arith.subf %1, %48 : vector<81x256xf32>
    %50 = math.exp %49 : vector<81x256xf32>
    %cst_10 = arith.constant 0.000000e+00 : f32
    %51 = vector.broadcast %cst_10 : f32 to vector<81x256xf32>
    %52 = arith.select %47, %50, %51 : vector<81x256xi1>, vector<81x256xf32>
    %53 = arith.mulf %52, %1 : vector<81x256xf32>
    %54 = arith.mulf %50, %1 : vector<81x256xf32>
    %55 = tpu.iota {dimensions = array<i32: 0>} : vector<8x81xi32>
    %56 = tpu.iota {dimensions = array<i32: 1>} : vector<8x81xi32>
    %57 = arith.sitofp %56 : vector<8x81xi32> to vector<8x81xf32>
    %cst_11 = arith.constant 5.000000e-01 : f32
    %58 = vector.broadcast %cst_11 : f32 to vector<8x81xf32>
    %59 = arith.addf %57, %58 : vector<8x81xf32>
    %cst_12 = arith.constant 0.111111112 : f32
    %60 = vector.broadcast %cst_12 : f32 to vector<8x81xf32>
    %61 = arith.mulf %59, %60 : vector<8x81xf32>
    %62 = math.floor %61 : vector<8x81xf32>
    %63 = arith.fptosi %62 : vector<8x81xf32> to vector<8x81xi32>
    %c9_i32_13 = arith.constant 9 : i32
    %64 = vector.broadcast %c9_i32_13 : i32 to vector<8x81xi32>
    %65 = arith.muli %63, %64 : vector<8x81xi32>
    %66 = arith.subi %56, %65 : vector<8x81xi32>
    %c4_i32 = arith.constant 4 : i32
    %67 = vector.broadcast %c4_i32 : i32 to vector<8x81xi32>
    %68 = arith.subi %63, %67 : vector<8x81xi32>
    %69 = arith.sitofp %68 : vector<8x81xi32> to vector<8x81xf32>
    %c4_i32_14 = arith.constant 4 : i32
    %70 = vector.broadcast %c4_i32_14 : i32 to vector<8x81xi32>
    %71 = arith.subi %66, %70 : vector<8x81xi32>
    %72 = arith.sitofp %71 : vector<8x81xi32> to vector<8x81xf32>
    %c0_i32 = arith.constant 0 : i32
    %73 = vector.broadcast %c0_i32 : i32 to vector<8x81xi32>
    %74 = arith.cmpi eq, %55, %73 : vector<8x81xi32>
    %c1_i32 = arith.constant 1 : i32
    %75 = vector.broadcast %c1_i32 : i32 to vector<8x81xi32>
    %76 = arith.cmpi eq, %55, %75 : vector<8x81xi32>
    %c2_i32 = arith.constant 2 : i32
    %77 = vector.broadcast %c2_i32 : i32 to vector<8x81xi32>
    %78 = arith.cmpi eq, %55, %77 : vector<8x81xi32>
    %cst_15 = arith.constant 0.000000e+00 : f32
    %79 = vector.broadcast %cst_15 : f32 to vector<8x81xf32>
    %80 = arith.select %78, %72, %79 : vector<8x81xi1>, vector<8x81xf32>
    %81 = arith.select %76, %69, %80 : vector<8x81xi1>, vector<8x81xf32>
    %cst_16 = arith.constant 1.000000e+00 : f32
    %82 = vector.broadcast %cst_16 : f32 to vector<8x81xf32>
    %83 = arith.select %74, %82, %81 : vector<8x81xi1>, vector<8x81xf32>
    %cst_17 = arith.constant dense<0.000000e+00> : vector<8x256xf32>
    %84 = tpu.matmul %83, %52, %cst_17 {dimension_numbers = #tpu.dot_dimension_numbers<[1], [0], [0], [1], [0, 0, 1, 1], [], []>, precision = #tpu.contract_precision<fp32>} : vector<8x81xf32>, vector<81x256xf32>, vector<8x256xf32> -> vector<8x256xf32>
    %85 = vector.extract_strided_slice %84 {offsets = [0, 0], sizes = [1, 256], strides = [1, 1]} : vector<8x256xf32> to vector<1x256xf32>
    %86 = vector.extract_strided_slice %84 {offsets = [1, 0], sizes = [1, 256], strides = [1, 1]} : vector<8x256xf32> to vector<1x256xf32>
    %87 = vector.extract_strided_slice %84 {offsets = [2, 0], sizes = [1, 256], strides = [1, 1]} : vector<8x256xf32> to vector<1x256xf32>
    %cst_18 = arith.constant dense<0.000000e+00> : vector<256xf32>
    %88 = vector.multi_reduction <add>, %53, %cst_18 [0] : vector<81x256xf32> to vector<256xf32>
    %89 = vector.shape_cast %88 : vector<256xf32> to vector<1x256xf32>
    %cst_19 = arith.constant dense<0.000000e+00> : vector<256xf32>
    %90 = vector.multi_reduction <add>, %50, %cst_19 [0] : vector<81x256xf32> to vector<256xf32>
    %91 = vector.shape_cast %90 : vector<256xf32> to vector<1x256xf32>
    %cst_20 = arith.constant dense<0.000000e+00> : vector<256xf32>
    %92 = vector.multi_reduction <add>, %54, %cst_20 [0] : vector<81x256xf32> to vector<256xf32>
    %93 = vector.shape_cast %92 : vector<256xf32> to vector<1x256xf32>
    %cst_21 = arith.constant 1.000000e+00 : f32
    %94 = vector.broadcast %cst_21 : f32 to vector<1x256xf32>
    %95 = arith.divf %94, %85 : vector<1x256xf32>
    %cst_22 = arith.constant 1.000000e+00 : f32
    %96 = vector.broadcast %cst_22 : f32 to vector<1x256xf32>
    %97 = arith.divf %96, %91 : vector<1x256xf32>
    %98 = math.log %85 : vector<1x256xf32>
    %99 = arith.addf %98, %14 : vector<1x256xf32>
    %100 = arith.mulf %89, %95 : vector<1x256xf32>
    %101 = arith.subf %99, %100 : vector<1x256xf32>
    %cst_23 = arith.constant 0.256949157 : f32
    %102 = vector.broadcast %cst_23 : f32 to vector<1x256xf32>
    %103 = arith.mulf %101, %102 : vector<1x256xf32>
    %104 = math.log %91 : vector<1x256xf32>
    %105 = arith.addf %104, %14 : vector<1x256xf32>
    %106 = arith.mulf %93, %97 : vector<1x256xf32>
    %107 = arith.subf %105, %106 : vector<1x256xf32>
    %cst_24 = arith.constant 0.227559805 : f32
    %108 = vector.broadcast %cst_24 : f32 to vector<1x256xf32>
    %109 = arith.mulf %107, %108 : vector<1x256xf32>
    %110 = arith.mulf %86, %95 : vector<1x256xf32>
    %111 = arith.mulf %87, %95 : vector<1x256xf32>
    %112 = tpu.concatenate %110, %111, %103, %109 in 0 : vector<1x256xf32>, vector<1x256xf32>, vector<1x256xf32>, vector<1x256xf32> -> vector<4x256xf32>
    %c0_25 = arith.constant 0 : index
    %c0_26 = arith.constant 0 : index
    %c0_27 = arith.constant 0 : index
    %113 = vector.load %arg3[%c0_25, %c0_26, %c0_27] : memref<1x4x256xf32, #tpu.memory_space<vmem>>, vector<1x4x256xf32>
    %114 = vector.shape_cast %113 : vector<1x4x256xf32> to vector<4x256xf32>
    %115 = vector.shape_cast %112 : vector<4x256xf32> to vector<1x4x256xf32>
    tpu.vector_store %arg3[%c0_25, %c0_26, %c0_27], %115 {strides = array<i32>} : memref<1x4x256xf32, #tpu.memory_space<vmem>>, vector<1x4x256xf32>,
    return
  }
  func.func @transform_0(%arg0: i32, %arg1: i32) -> (i32, i32, i32) {
    %c0_i32 = arith.constant 0 : i32
    %c0_i32_0 = arith.constant 0 : i32
    return %arg1, %c0_i32, %arg0 : i32, i32, i32
  }
  func.func @transform_1(%arg0: i32, %arg1: i32) -> (i32, i32, i32) {
    %c0_i32 = arith.constant 0 : i32
    %c0_i32_0 = arith.constant 0 : i32
    return %arg1, %c0_i32, %arg0 : i32, i32, i32
  }
}

</mosaic_0001>

<bundles_post_ra>
// kernel: tpu_custom_call.1
= control target key start
LH: loop header
LB: loop body
LE: loop exit
PB: predicated region body
PF: predicated region fallthrough
CT: control target
= control target key end

     0   :  { %6 = vsyncpa [#allocation3], 0  ;;  %s3482_s0 = inlined_call_operand.vmem [shape: f32[2,81,256], index: 0, kind: input, shape index: {}]   ;;  %s3483_s1 = inlined_call_operand.hbm [shape: f32[2,4,256], index: 1, kind: output, shape index: {}]  }
   0x1   :  { %8 = vsyncpa [#allocation3 + $0x1], 0  ;;  %s2104_s6 = smov 0   ;;  %s2106_s7 = smov 0  }
   0x2   :  { %s2108_s8 = smov 0   ;;  %s2110_s9 = smov 0  }
   0x3   :  { %s2112_s10 = smov 0   ;;  %s2114_s11 = smov 0  }
   0x4 LB: > { %s1700_s12 = sadd.s32 4294967295, %s2090_s11   ;;  %s1701_s13 = sadd.s32 4294967294, %s2090_s11   ;;  %s2090_s11 = sphi %s2114_s11, %s14_s11   ;;  %s2086_s10 = sphi %s2112_s10, %s3748_s10   ;;  %s2082_s9 = sphi %s2110_s9, %s3747_s9   ;;  %s2078_s8 = sphi %s2108_s8, %s3746_s8   ;;  %s2074_s7 = sphi %s2106_s7, %s3745_s7   ;;  %s2070_s6 = sphi %s2104_s6, %s3744_s6  }
   0x5   : > { %s23_s14 = sadd.s32 1, %s2086_s10  ;;  %s63_s15 = sadd.s32 1, %s2078_s8 }
   0x6   : > { %p24_p0 = scmp.ge.s32.totalorder %s23_s14, 2  ;;  %p73_p1 = scmp.ne.s32.totalorder %s2078_s8, %s2074_s7 }
   0x7   : > { %p74_p2 = scmp.eq.s32.totalorder %s1700_s12, 1  ;;  %p79_p3 = scmp.ne.s32.totalorder %s2074_s7, %s2070_s6 }
   0x8   : > { %s3750_s14 = smov (%p24_p0, %s23_s14), 0  ;;  %p80_p5 = scmp.eq.s32.totalorder %s1701_s13, 1 }
   0x9   : > { %p2144_p4 = por %p74_p2, %p73_p1  ;;  %s58_s17 = ssub.s32 %s2086_s10, %s3750_s14 }
   0xa   : > { %p1704_p6 = scmp.ge.s32.totalorder %s2090_s11, 1  ;;  %p61_p7 = scmp.eq.s32.totalorder %s58_s17, 0 }
   0xb   : > { %p2151_p8 = por %p80_p5, %p79_p3  ;;  %p111_p9 = scmp.lt.s32.totalorder %s2090_s11, 3 }
   0xc   : > { %s2157_s19 = scalar_select %p61_p7, %s2078_s8, %s63_s15  }
   0xd   : > { %p112_p10 = pnand %p1704_p6, %p111_p9 }
   0xf   : > { %115 = sbr.rel (%p112_p10) target bundleno = 498 (0x1f2), region = 24 }
  0x16   : > { %p136_p11 = scmp.lt.s32.totalorder %s2082_s9, 1  ;;  %v168_v0 = vlaneseq  ;;  %vm265_vm0 = vcmask 1040384   ;;  %s132_s25 = sand.u32 1, %s2074_s7  }
  0x17   : > { %s1705_s26 = sshll.u32 %s132_s25, 3  ;;  %s1714_s27 = sshll.u32 %s2082_s9, 7 }
  0x18   : > { %s137_s20 = scalar_select %p136_p11, %s2082_s9, 1  ;;  %v2162_v1 = vshrl.u32 %v168_v0, 7 }
  0x19   : > { %s134_s28 = scalar_lea.vmem [#allocation2], %s1705_s26  ;;  %s3433_s3 = scalar_lea.hbm %s3483_s1, %s1714_s27 }
  0x1a   : > { %3569 = vst [vmem:[#allocation5_spill] sm:$0xff] %v2162_v1  ;;  %s1845_s21 = smul.u32 176, %s137_s20  ;;  %v2165_v2 = vadd.s32 8, %v2162_v1  ;;  %v180_v3 = vcvt.s32.f32 %v2162_v1  ;;  %v2184_v8 = vadd.s32 16, %v2162_v1  ;;  %v2196_v12 = vadd.s32 24, %v2162_v1  ;;  %s1624_s29 = sshll.u32 %s134_s28, 4  ;;  %s3435_s29 = int_to_ptr.vmem [resolvable:$true] %s1624_s29 }
  0x1b   : > { %v2269_v55 = vadd.s32 32, %v2162_v1  ;;  %v2274_v58 = vadd.s32 40, %v2162_v1  ;;  %s1608_s4 = scalar_lea.sflag [#allocation3], %s132_s25  ;;  %s2012_s5 = scalar_lea.vmem %s3435_s29, 128 }
  0x1c   : > { %s2170_s24 = scalar_lea.vmem %s3482_s0, %s1845_s21  ;;  %v181_v4 = vcvt.s32.f32 %v2165_v2  ;;  %v191_v13 = vadd.f32 0.5, %v180_v3  ;;  %v182_v19 = vcvt.s32.f32 %v2184_v8  ;;  %v183_v25 = vcvt.s32.f32 %v2196_v12  ;;  %p2013_p12 = scmp.ne.s32.totalorder %s3435_s29, %s2012_s5 }
  0x1d   : > { %v2175_v5 = vld [vmem:[%s2170_s24 + $0x8] sm:$0xff]  ;;  %v2178_v6 = vld [vmem:[%s2170_s24 + $0x18] sm:$0xff]  ;;  %v2217_v24 = vld [vmem:[%s2170_s24] sm:$0xff]  ;;  %s2093_s9 = smov [#allocation2]  }
  0x1e   : > { %v2181_v7 = vld [vmem:[%s2170_s24 + $0x28] sm:$0xff]  ;;  %v2187_v9 = vld [vmem:[%s2170_s24 + $0x38] sm:$0xff]  ;;  %v192_v14 = vadd.f32 0.5, %v181_v4  ;;  %v202_v22 = vmul.f32 0.11111111, %v191_v13  ;;  %v2222_v28 = vld [vmem:[%s2170_s24 + $0x10] sm:$0xff]  ;;  %v184_v4 = vcvt.s32.f32 %v2269_v55  ;;  %p2014_p13 = pnand %p2013_p12, %p2144_p4 }
  0x1f   : > { %v2190_v10 = vld [vmem:[%s2170_s24 + $0x48] sm:$0xff]  ;;  %v2193_v11 = vld [vmem:[%s2170_s24 + $0x58] sm:$0xff]  ;;  %v275_v15 = vmax.f32 %v2175_v5, %v2181_v7  ;;  %v276_v18 = vmax.f32 %v2178_v6, %v2187_v9  ;;  %v2225_v29 = vld [vmem:[%s2170_s24 + $0x20] sm:$0xff]  ;;  %v193_v41 = vadd.f32 0.5, %v182_v19  ;;  %v194_v46 = vadd.f32 0.5, %v183_v25  ;;  %s2016_s12 = sshll.u32 %s2093_s9, 4  ;;  %s2017_s12 = int_to_ptr.vmem [resolvable:$false] %s2016_s12 }
  0x20   : > { %v2201_v16 = vld [vmem:[%s2170_s24 + $0x68] sm:$0xff]  ;;  %v2204_v17 = vld [vmem:[%s2170_s24 + $0x78] sm:$0xff]  ;;  %v203_v26 = vmul.f32 0.11111111, %v192_v14  ;;  %v2228_v30 = vld [vmem:[%s2170_s24 + $0x30] sm:$0xff]  ;;  %v257_v35 = vmax.f32 %v2217_v24, %v2225_v29  ;;  %v213_v47 = vfloor.f32 %v202_v22  ;;  %p2015_p0 = pneg %p2014_p13  ;;  %s2018_s13 = scalar_lea.vmem %s2017_s12, 256 }
  0x21   : > { %3570 = vst [vmem:[#allocation6_spill] sm:$0xff] %v2201_v16  ;;  %3571 = vst [vmem:[#allocation7_spill] sm:$0xff] %v2204_v17  ;;  %v2210_v20 = vld [vmem:[%s2170_s24 + $0x88] sm:$0xff]  ;;  %v277_v23 = vmax.f32 %v275_v15, %v2190_v10  ;;  %v278_v27 = vmax.f32 %v276_v18, %v2193_v11  ;;  %v2231_v31 = vld [vmem:[%s2170_s24 + $0x98] sm:$0xff]  ;;  %v258_v36 = vmax.f32 %v2222_v28, %v2228_v30  ;;  %v204_v57 = vmul.f32 0.11111111, %v193_v41  ;;  %p2019_p1 = scmp.lt.s32.totalorder %s3435_s29, %s2017_s12  ;;  %p2020_p2 = scmp.lt.s32.totalorder %s2018_s13, %s2012_s5 }
  0x22   : > { %3572 = vst [vmem:[#allocation8_spill] sm:$0xff] %v2210_v20  ;;  %v2213_v21 = vld [vmem:[%s2170_s24 + $0xa8] sm:$0x1]  ;;  %3574 = vst [vmem:[#allocation10_spill] sm:$0xff] %v2231_v31  ;;  %v2235_v33 = vld [vmem:[%s2170_s24 + $0x40] sm:$0xff]  ;;  %v214_v48 = vfloor.f32 %v203_v26  ;;  %v1846_v62 = vtrunc.f32 %v213_v47  ;;  %v185_v18 = vcvt.s32.f32 %v2274_v58  ;;  %v2297_v47 = vadd.s32 72, %v2162_v1 }
  0x23   : > { %3573 = vst [vmem:[#allocation9_spill] sm:$0xff] %v2213_v21  ;;  %v279_v32 = vmax.f32 %v277_v23, %v2201_v16  ;;  %v2238_v34 = vld [vmem:[%s2170_s24 + $0x50] sm:$0xff]  ;;  %v280_v37 = vmax.f32 %v278_v27, %v2204_v17  ;;  %v283_v38 = vsel %vm265_vm0, %v2213_v21, -inf  ;;  %v2248_v39 = vld [vmem:[%s2170_s24 + $0x60] sm:$0xff]  ;;  %v259_v44 = vmax.f32 %v257_v35, %v2235_v33  ;;  %p2021_p3 = por %p2020_p2, %p2019_p1 }
  0x24   : > { %v2251_v40 = vld [vmem:[%s2170_s24 + $0x70] sm:$0xff]  ;;  %v2255_v43 = vld [vmem:[%s2170_s24 + $0xa0] sm:$0x1]  ;;  %v260_v45 = vmax.f32 %v258_v36, %v2238_v34  ;;  %v205_v61 = vmul.f32 0.11111111, %v194_v46  ;;  %v1848_v63 = vtrunc.f32 %v214_v48  ;;  %v215_v15 = vfloor.f32 %v204_v57 }
  0x25   : > { %v281_v42 = vmax.f32 %v279_v32, %v2210_v20  ;;  %3575 = vst [vmem:[#allocation11_spill] sm:$0xff] %v2255_v43  ;;  %v282_v49 = vmax.f32 %v280_v37, %v2231_v31  ;;  %v2261_v50 = vld [vmem:[%s2170_s24 + $0x80] sm:$0xff]  ;;  %v2264_v52 = vld [vmem:[%s2170_s24 + $0x90] sm:$0xff]  ;;  %v261_v53 = vmax.f32 %v259_v44, %v2248_v39  ;;  %v266_v56 = vsel %vm265_vm0, %v2255_v43, -inf  ;;  %p2022_p5 = pnand %p2021_p3, %p2015_p0 }
  0x26   : > { %v262_v54 = vmax.f32 %v260_v45, %v2251_v40  ;;  %v216_v23 = vfloor.f32 %v205_v61  ;;  %v1847_v25 = vcvt.f32.s32 %v1846_v62  ;;  %v1849_v26 = vcvt.f32.s32 %v1848_v63 }
  0x27   : > { %v284_v51 = vmax.f32 %v281_v42, %v283_v38  ;;  %v263_v60 = vmax.f32 %v261_v53, %v2261_v50  ;;  %v195_v27 = vadd.f32 0.5, %v184_v4  ;;  %v2281_v35 = vand.u32 127, %v168_v0 }
  0x28   : > { %v264_v3 = vmax.f32 %v262_v54, %v2264_v52  ;;  %v2284_v36 = vadd.s32 48, %v2162_v1  ;;  %v2287_v37 = vadd.s32 56, %v2162_v1  ;;  %v2289_v38 = vtrunc.f32 %v215_v15 }
  0x29   : > { %v285_v59 = vmax.f32 %v284_v51, %v282_v49  ;;  %v267_v14 = vmax.f32 %v263_v60, %v266_v56  ;;  %3576 = vst [vmem:[#allocation12_spill] sm:$0xff] %v2281_v35  ;;  %v196_v41 = vadd.f32 0.5, %v185_v18  ;;  %v2292_v42 = vadd.s32 64, %v2162_v1 }
  0x2a   : > { %v2294_v46 = vtrunc.f32 %v216_v23  ;;  %v2299_v0 = vmul.u32 9, %v1847_v25  ;;  %v2301_v48 = vmul.u32 9, %v1849_v26  ;;  %v206_v49 = vmul.f32 0.11111111, %v195_v27 }
  0x2b   : > { %v286_v13 = vrot.slane %v285_v59, 4  ;;  %v268_v22 = vmax.f32 %v267_v14, %v264_v3  ;;  %v2304_v51 = vadd.s32 80, %v2162_v1  ;;  %v186_v54 = vcvt.s32.f32 %v2284_v36 }
  0x2c   : > { %v187_v56 = vcvt.s32.f32 %v2287_v37  ;;  %v3485_v57 = vcvt.f32.s32 %v2289_v38  ;;  %v2313_v63 = vadd.s32 3, %v1847_v25  ;;  %v3484_v4 = vcvt.f32.s32 %v2294_v46 }
  0x2d   : > { %v287_v19 = vmax.f32 %v285_v59, %v286_v13  ;;  %v269_v45 = vrot.slane %v268_v22, 4  ;;  %v207_v59 = vmul.f32 0.11111111, %v196_v41  ;;  %v246_v13 = vsub.s32 %v2162_v1, %v2299_v0 }
  0x2e   : > { %v247_v14 = vsub.s32 %v2165_v2, %v2301_v48  ;;  %v2320_v15 = vadd.s32 3, %v1849_v26  ;;  %v217_v18 = vfloor.f32 %v206_v49  ;;  %v238_v26 = vmul.u32 9, %v3484_v4 }
  0x2f   : > { %v288_v32 = vrot.slane %v287_v19, 2  ;;  %v270_v3 = vmax.f32 %v268_v22, %v269_v45  ;;  %v218_v22 = vfloor.f32 %v207_v59 }
  0x30   : > { %v1854_v0 = vtrunc.f32 %v217_v18 }
  0x31   : > { %v289_v44 = vmax.f32 %v287_v19, %v288_v32  ;;  %v237_v19 = vmul.u32 9, %v3485_v57  ;;  %v271_v25 = vrot.slane %v270_v3, 2 }
  0x33   : > { %v290_v53 = vrot.slane %v289_v44, 1  ;;  %v272_v18 = vmax.f32 %v270_v3, %v271_v25  ;;  %v249_v3 = vsub.s32 %v2196_v12, %v238_v26  ;;  %v198_v25 = vadd.f32 0.5, %v187_v56 }
  0x35   : > { %v2311_v62 = vmax.f32 %v289_v44, %v290_v53  ;;  %v2381_v56 = vadd.s32 3, %v249_v3 }
  0x37   : > { %3577 = vst [vmem:[#allocation13_spill] sm:$0xff] %v2311_v62  ;;  %vm293_vm1 = vcmp.eq.f32.partialorder %v2175_v5, %v2311_v62  ;;  %vm295_vm2 = vcmp.eq.f32.partialorder %v2178_v6, %v2311_v62  ;;  %vm297_vm3 = vcmp.eq.f32.partialorder %v2181_v7, %v2311_v62  ;;  %vm299_vm4 = vcmp.eq.f32.partialorder %v2187_v9, %v2311_v62 }
  0x38   : > { %vm301_vm5 = vcmp.eq.f32.partialorder %v2190_v10, %v2311_v62  ;;  %vm303_vm6 = vcmp.eq.f32.partialorder %v2193_v11, %v2311_v62  ;;  %vm305_vm7 = vcmp.eq.f32.partialorder %v2201_v16, %v2311_v62  ;;  %v315_v23 = vsel %vm293_vm1, %v2162_v1, 81 }
  0x39   : > { %vm307_vm8 = vcmp.eq.f32.partialorder %v2204_v17, %v2311_v62  ;;  %v317_v27 = vsel %vm295_vm2, %v2165_v2, 81  ;;  %v319_v32 = vsel %vm297_vm3, %v2184_v8, 81  ;;  %v321_v41 = vsel %vm299_vm4, %v2196_v12, 81 }
  0x3a   : > { %vm313_vm9 = vcmp.eq.f32.partialorder %v2213_v21, %v2311_v62  ;;  %v323_v44 = vsel %vm301_vm5, %v2269_v55, 81  ;;  %v325_v45 = vsel %vm303_vm6, %v2274_v58, 81  ;;  %vm309_vm10 = vcmp.eq.f32.partialorder %v2210_v20, %v2311_v62 }
  0x3b   : > { %vm311_vm11 = vcmp.eq.f32.partialorder %v2231_v31, %v2311_v62  ;;  %vm366_vm12 = vcmp.lt.s32.totalorder %v315_v23, %v319_v32  ;;  %vm368_vm13 = vcmp.lt.s32.totalorder %v317_v27, %v321_v41  ;;  %v327_v48 = vsel %vm305_vm7, %v2284_v36, 81 }
  0x3c   : > { %v329_v49 = vsel %vm307_vm8, %v2287_v37, 81  ;;  %v367_v53 = vsel %vm366_vm12, %v315_v23, %v319_v32  ;;  %v369_v59 = vsel %vm368_vm13, %v317_v27, %v321_v41  ;;  %v335_v61 = vsel %vm313_vm9, %v2304_v51, 81 }
  0x3d   : > { %vm370_vm14 = vcmp.lt.s32.totalorder %v367_v53, %v323_v44  ;;  %vm372_vm15 = vcmp.lt.s32.totalorder %v369_v59, %v325_v45  ;;  %v331_v60 = vsel %vm309_vm10, %v2292_v42, 81  ;;  %v333_v4 = vsel %vm311_vm11, %v2297_v47, 81 }
  0x3e   : > { %v371_v57 = vsel %vm370_vm14, %v367_v53, %v323_v44  ;;  %v373_v35 = vsel %vm372_vm15, %v369_v59, %v325_v45  ;;  %v248_v21 = vsub.s32 %v2184_v8, %v237_v19  ;;  %v1856_v31 = vtrunc.f32 %v218_v22 }
  0x3f   : > { %vm374_vm1 = vcmp.lt.s32.totalorder %v371_v57, %v327_v48  ;;  %vm376_vm2 = vcmp.lt.s32.totalorder %v373_v35, %v329_v49  ;;  %v382_v23 = vsel %vm265_vm0, %v335_v61, 2147483647  ;;  %v197_v27 = vadd.f32 0.5, %v186_v54 }
  0x40   : > { %v375_v20 = vsel %vm374_vm1, %v371_v57, %v327_v48  ;;  %v377_v17 = vsel %vm376_vm2, %v373_v35, %v329_v49  ;;  %v273_v16 = vrot.slane %v272_v18, 1  ;;  %v1855_v44 = vcvt.f32.s32 %v1854_v0 }
  0x41   : > { %vm378_vm3 = vcmp.lt.s32.totalorder %v375_v20, %v331_v60  ;;  %vm380_vm4 = vcmp.lt.s32.totalorder %v377_v17, %v333_v4  ;;  %v2365_v45 = vadd.s32 3, %v246_v13  ;;  %v2367_v53 = vadd.s32 3, %v247_v14 }
  0x42   : > { %v379_v32 = vsel %vm378_vm3, %v375_v20, %v331_v60  ;;  %v381_v41 = vsel %vm380_vm4, %v377_v17, %v333_v4  ;;  %v3578_v57 = vcvt.f32.s32 %v2289_v38  ;;  %v2373_v54 = vmax.f32 %v272_v18, %v273_v16 }
  0x43   : > { %vm383_vm5 = vcmp.lt.s32.totalorder %v379_v32, %v382_v23  ;;  %v3580_v19 = vcvt.f32.s32 %v2294_v46  ;;  %v1857_v20 = vcvt.f32.s32 %v1856_v31  ;;  %v2379_v17 = vadd.s32 3, %v248_v21 }
  0x44   : > { %v2371_v35 = vadd.s32 3, %v3578_v57  ;;  %v384_v61 = vsel %vm383_vm5, %v379_v32, %v382_v23  ;;  %3579 = vst [vmem:[#allocation14_spill] sm:$0xff] %v2373_v54  ;;  %v2383_v60 = vmul.f32 0.11111111, %v197_v27  ;;  %vm292_vm7 = vcmp.eq.f32.partialorder %v2217_v24, %v2373_v54 }
  0x45   : > { %v2377_v22 = vadd.s32 3, %v3580_v19  ;;  %vm385_vm6 = vcmp.lt.s32.totalorder %v384_v61, %v381_v41  ;;  %v2387_v38 = vmul.u32 9, %v1855_v44  ;;  %v2389_v16 = vmul.f32 0.11111111, %v198_v25 }
  0x46   : > { %v386_v4 = vsel %vm385_vm6, %v384_v61, %v381_v41  ;;  %vm294_vm8 = vcmp.eq.f32.partialorder %v2222_v28, %v2373_v54  ;;  %vm296_vm9 = vcmp.eq.f32.partialorder %v2225_v29, %v2373_v54  ;;  %vm298_vm10 = vcmp.eq.f32.partialorder %v2228_v30, %v2373_v54 }
  0x47   : > { %v387_v13 = vrot.slane %v386_v4, 4  ;;  %v543_v21 = vsub.f32 %v2175_v5, %v2311_v62  ;;  %v2399_v31 = vmul.u32 9, %v1857_v20  ;;  %v2401_v46 = vadd.s32 3, %v1855_v44 }
  0x48   : > { %v2403_v14 = vadd.s32 3, %v1857_v20  ;;  %vm300_vm12 = vcmp.eq.f32.partialorder %v2235_v33, %v2373_v54  ;;  %vm302_vm13 = vcmp.eq.f32.partialorder %v2238_v34, %v2373_v54  ;;  %v314_v26 = vsel %vm292_vm7, %v2162_v1, 81 }
  0x49   : > { %vm388_vm11 = vcmp.lt.s32.totalorder %v386_v4, %v387_v13  ;;  %v316_v48 = vsel %vm294_vm8, %v2165_v2, 81  ;;  %v318_v49 = vsel %vm296_vm9, %v2184_v8, 81  ;;  %v320_v59 = vsel %vm298_vm10, %v2196_v12, 81 }
  0x4a   : > { %v389_v0 = vsel %vm388_vm11, %v386_v4, %v387_v13  ;;  %v545_v23 = vsub.f32 %v2178_v6, %v2311_v62  ;;  %vm304_vm14 = vcmp.eq.f32.partialorder %v2248_v39, %v2373_v54  ;;  %vm306_vm15 = vcmp.eq.f32.partialorder %v2251_v40, %v2373_v54 }
  0x4b   : > { %v390_v18 = vrot.slane %v389_v0, 2  ;;  %vm308_vm1 = vcmp.eq.f32.partialorder %v2261_v50, %v2373_v54  ;;  %vm310_vm2 = vcmp.eq.f32.partialorder %v2264_v52, %v2373_v54  ;;  %vm312_vm3 = vcmp.eq.f32.partialorder %v2255_v43, %v2373_v54 }
  0x4c   : > { %v322_v2 = vsel %vm300_vm12, %v2269_v55, 81  ;;  %v324_v8 = vsel %vm302_vm13, %v2274_v58, 81  ;;  %vm336_vm5 = vcmp.lt.s32.totalorder %v314_v26, %v318_v49  ;;  %vm338_vm6 = vcmp.lt.s32.totalorder %v316_v48, %v320_v59 }
  0x4d   : > { %vm391_vm4 = vcmp.lt.s32.totalorder %v389_v0, %v390_v18  ;;  %v326_v27 = vsel %vm304_vm14, %v2284_v36, 81  ;;  %v337_v3 = vsel %vm336_vm5, %v314_v26, %v318_v49  ;;  %v339_v25 = vsel %vm338_vm6, %v316_v48, %v320_v59 }
  0x4e   : > { %v392_v12 = vsel %vm391_vm4, %v389_v0, %v390_v18  ;;  %v328_v41 = vsel %vm306_vm15, %v2287_v37, 81  ;;  %v334_v44 = vsel %vm312_vm3, %v2304_v51, 81  ;;  %vm340_vm7 = vcmp.lt.s32.totalorder %v337_v3, %v322_v2 }
  0x4f   : > { %v393_v32 = vrot.slane %v392_v12, 1  ;;  %v547_v57 = vsub.f32 %v2181_v7, %v2311_v62  ;;  %v330_v61 = vsel %vm308_vm1, %v2292_v42, 81  ;;  %v341_v19 = vsel %vm340_vm7, %v337_v3, %v322_v2 }
  0x50   : > { %vm342_vm8 = vcmp.lt.s32.totalorder %v339_v25, %v324_v8  ;;  %v332_v20 = vsel %vm310_vm2, %v2297_v47, 81  ;;  %vm344_vm10 = vcmp.lt.s32.totalorder %v341_v19, %v326_v27  ;;  %v352_v0 = vsel %vm265_vm0, %v334_v44, 2147483647 }
  0x51   : > { %vm394_vm9 = vcmp.lt.s32.totalorder %v392_v12, %v393_v32  ;;  %v343_v4 = vsel %vm342_vm8, %v339_v25, %v324_v8  ;;  %v345_v26 = vsel %vm344_vm10, %v341_v19, %v326_v27  ;;  %v219_v59 = vfloor.f32 %v2383_v60 }
  0x52   : > { %v395_v13 = vsel %vm394_vm9, %v392_v12, %v393_v32  ;;  %vm346_vm11 = vcmp.lt.s32.totalorder %v343_v4, %v328_v41  ;;  %vm348_vm12 = vcmp.lt.s32.totalorder %v345_v26, %v330_v61  ;;  %v549_v18 = vsub.f32 %v2187_v9, %v2311_v62 }
  0x53   : > { %v397_v48 = vcvt.s32.f32 %v395_v13  ;;  %v347_v49 = vsel %vm346_vm11, %v343_v4, %v328_v41  ;;  %v566_v2 = vmul.f32 1.442695, %v543_v21  ;;  %v349_v3 = vsel %vm348_vm12, %v345_v26, %v330_v61 }
  0x54   : > { %vm350_vm13 = vcmp.lt.s32.totalorder %v347_v49, %v332_v20  ;;  %v570_v43 = vmul.f32 1.442695, %v545_v23  ;;  %vm353_vm14 = vcmp.lt.s32.totalorder %v349_v3, %v352_v0  ;;  %v551_v12 = vsub.f32 %v2190_v10, %v2311_v62 }
  0x55   : > { %v399_v1 = vadd.f32 0.5, %v397_v48  ;;  %v351_v8 = vsel %vm350_vm13, %v347_v49, %v332_v20  ;;  %v574_v27 = vmul.f32 1.442695, %v547_v57  ;;  %v354_v25 = vsel %vm353_vm14, %v349_v3, %v352_v0 }
  0x56   : > { %v220_v32 = vfloor.f32 %v2389_v16  ;;  %vm355_vm15 = vcmp.lt.s32.totalorder %v354_v25, %v351_v8  ;;  %v250_v60 = vsub.s32 %v2269_v55, %v2387_v38  ;;  %v251_v21 = vsub.s32 %v2274_v58, %v2399_v31 }
  0x57   : > { %v401_v41 = vmul.f32 0.11111111, %v399_v1  ;;  %1930 = vpow2.f32 %v566_v2  ;;  %v578_v44 = vmul.f32 1.442695, %v549_v18  ;;  %v356_v23 = vsel %vm355_vm15, %v354_v25, %v351_v8 }
  0x58   : > { %v542_v61 = vsub.f32 %v2217_v24, %v2373_v54  ;;  %1932 = vpow2.f32 %v570_v43  ;;  %v357_v57 = vrot.slane %v356_v23, 4  ;;  %v544_v16 = vsub.f32 %v2222_v28, %v2373_v54 }
  0x59   : > { %v403_v19 = vfloor.f32 %v401_v41  ;;  %1934 = vpow2.f32 %v574_v27  ;;  %v582_v1 = vmul.f32 1.442695, %v551_v12  ;;  %v546_v55 = vsub.f32 %v2225_v29, %v2373_v54 }
  0x5a   : > { %v3581_v38 = vcvt.s32.f32 %v2292_v42  ;;  %vm358_vm1 = vcmp.lt.s32.totalorder %v356_v23, %v357_v57  ;;  %v2461_v20 = vadd.s32 3, %v250_v60  ;;  %v2463_v4 = vadd.s32 3, %v251_v21 }
  0x5b   : > { %v1870_v31 = vtrunc.f32 %v403_v19  ;;  %1936 = vpow2.f32 %v578_v44  ;;  %v359_v43 = vsel %vm358_vm1, %v356_v23, %v357_v57  ;;  %v548_v26 = vsub.f32 %v2228_v30, %v2373_v54 }
  0x5c   : > { %v2459_v58 = vadd.f32 0.5, %v3581_v38  ;;  %v564_v0 = vmul.f32 1.442695, %v542_v61  ;;  %v360_v49 = vrot.slane %v359_v43, 2  ;;  %v568_v18 = vmul.f32 1.442695, %v544_v16 }
  0x5d   : > { %v2467_v48 = vcvt.f32.s32 %v1870_v31  ;;  %v553_v2 = vsub.f32 %v2193_v11, %v2311_v62  ;;  %1938 = vpow2.f32 %v582_v1  ;;  %v550_v3 = vsub.f32 %v2235_v33, %v2373_v54 }
  0x5e   : > { %v572_v8 = vmul.f32 1.442695, %v546_v55  ;;  %v2473_v12 = vtrunc.f32 %v219_v59  ;;  %vm361_vm2 = vcmp.lt.s32.totalorder %v359_v43, %v360_v49  ;;  %v2478_v41 = vtrunc.f32 %v220_v32 }
  0x5f   : > { %v407_v27 = vmul.u32 9, %v2467_v48  ;;  %v422_v25 = vsub.s32 %v2313_v63, %v2467_v48  ;;  %v424_v60 = vsub.s32 %v2320_v15, %v2467_v48  ;;  %v362_v21 = vsel %vm361_vm2, %v359_v43, %v360_v49 }
  0x60   : > { %1940 = vpow2.f32 %v564_v0  ;;  %v576_v44 = vmul.f32 1.442695, %v548_v26  ;;  %v363_v61 = vrot.slane %v362_v21, 1  ;;  %v426_v59 = vsub.s32 %v2371_v35, %v2467_v48 }
  0x61   : > { %v2482_v23 = vsub.s32 %v395_v13, %v407_v27  ;;  %1942 = vpow2.f32 %v568_v18  ;;  %v2486_v19 = vpop.eup %1930  ;;  %v580_v57 = vmul.f32 1.442695, %v550_v3  ;;  %v428_v32 = vsub.s32 %v2377_v22, %v2467_v48 }
  0x62   : > { %3582 = vst [vmem:[#allocation15_spill] sm:$0xff] %v2486_v19  ;;  %1944 = vpow2.f32 %v572_v8  ;;  %v586_v16 = vmul.f32 1.442695, %v553_v2  ;;  %v2490_v1 = vpop.eup %1932  ;;  %vm2492_vm3 = vcmp.le.u32.totalorder %v422_v25, 6  ;;  %vm364_vm4 = vcmp.lt.s32.totalorder %v362_v21, %v363_v61 }
  0x63   : > { %3583 = vst [vmem:[#allocation16_spill] sm:$0xff] %v2490_v1  ;;  %v477_v13 = vsub.s32 %v2365_v45, %v2482_v23  ;;  %v479_v38 = vsub.s32 %v2367_v53, %v2482_v23  ;;  %v2500_v31 = vpop.eup %1934  ;;  %vm2502_vm5 = vcmp.le.u32.totalorder %v424_v60, 6  ;;  %v2506_v26 = vsel %vm364_vm4, %v362_v21, %v363_v61 }
  0x64   : > { %3586 = vst [vmem:[#allocation17_spill] sm:$0xff] %v2500_v31  ;;  %v481_v0 = vsub.s32 %v2379_v17, %v2482_v23  ;;  %v483_v49 = vsub.s32 %v2381_v56, %v2482_v23  ;;  %v396_v2 = vcvt.s32.f32 %v2506_v26  ;;  %vm2517_vm8 = vcmp.le.u32.totalorder %v426_v59, 6 }
  0x65   : > { %vm499_vm6 = vcmp.le.u32.totalorder %v477_v13, 6  ;;  %vm2512_vm7 = vcmp.le.u32.totalorder %v479_v38, 6  ;;  %v2521_v8 = vpop.eup %1936  ;;  %vm2525_vm10 = vcmp.le.u32.totalorder %v428_v32, 6  ;;  %1946 = vpow2.f32 %v586_v16 }
  0x66   : > { %3593 = vst [vmem:[#allocation18_spill] sm:$0xff] %v2521_v8  ;;  %vm521_vm9 = vmand %vm2492_vm3, %vm499_vm6  ;;  %vm2529_vm11 = vcmp.le.u32.totalorder %v481_v0, 6  ;;  %vm2533_vm12 = vcmp.le.u32.totalorder %v483_v49, 6  ;;  %v398_v61 = vadd.f32 0.5, %v396_v2  ;;  %v552_v59 = vsub.f32 %v2238_v34, %v2373_v54 }
  0x67   : > { %vm523_vm13 = vmand %vm2502_vm5, %vm2512_vm7  ;;  %v609_v21 = vsel %vm521_vm9, %v2486_v19, 0.0  ;;  %v1859_v32 = vcvt.f32.s32 %v2473_v12  ;;  %v2545_v55 = vpop.eup %1938  ;;  %v430_v43 = vsub.s32 %v2401_v46, %v2467_v48  ;;  %1948 = vpow2.f32 %v576_v44 }
  0x68   : > { %3600 = vst [vmem:[#allocation19_spill] sm:$0xff] %v2545_v55  ;;  %v2548_v13 = vsel %vm523_vm13, %v2490_v1, 0.0  ;;  %v631_v16 = vmul.f32 %v609_v21, %v2175_v5  ;;  %v703_v38 = vand.u32 4294901760, %v609_v21  ;;  %vm525_vm14 = vmand %vm2517_vm8, %vm2529_vm11  ;;  %v400_v49 = vmul.f32 0.11111111, %v398_v61 }
  0x69   : > { %v633_v0 = vmul.f32 %v2548_v13, %v2178_v6  ;;  %v3503_v12 = vand.u32 4294901760, %v2548_v13  ;;  %vm527_vm15 = vmand %vm2525_vm10, %vm2533_vm12  ;;  %v2565_v5 = vsel %vm525_vm14, %v2500_v31, 0.0  ;;  %v432_v6 = vsub.s32 %v2403_v14, %v2467_v48 }
  0x6a   : > { %v2567_v18 = vpop.eup %1940  ;;  %v635_v2 = vmul.f32 %v2565_v5, %v2181_v7  ;;  %v1861_v3 = vcvt.f32.s32 %v2478_v41  ;;  %v402_v61 = vfloor.f32 %v400_v49  ;;  %v2581_v31 = vsel %vm527_vm15, %v2521_v8, 0.0 }
  0x6b   : > { %v2574_v25 = vpop.eup %1942  ;;  %v2578_v27 = vpack.c.bf16 %v3503_v12, %v703_v38  ;;  %v1445_v60 = vadd.f32 %v633_v0, %v631_v16  ;;  %v637_v7 = vmul.f32 %v2581_v31, %v2187_v9  ;;  %vm2587_vm1 = vcmp.le.u32.totalorder %v430_v43, 6 }
  0x6c   : > { %v2583_v44 = vpop.eup %1944  ;;  %v584_v41 = vmul.f32 1.442695, %v552_v59  ;;  %v2591_v19 = vmul.u32 9, %v1859_v32  ;;  %v1868_v16 = vtrunc.f32 %v402_v61  ;;  %v485_v49 = vsub.s32 %v2461_v20, %v2482_v23 }
  0x6d   : > { %3601 = vst [vmem:[#allocation20_spill] sm:$0xff] %v2578_v27  ;;  %3602 = vst [vmem:[#allocation21_spill] sm:$0xff] %v2583_v44  ;;  %1716 = vmatprep.subr.bf16.mxu1 %v2578_v27  ;;  %1776 = vmatprep.subr.bf16.mxu0 %v2578_v27  ;;  %v1446_v0 = vadd.f32 %v1445_v60, %v635_v2  ;;  %v487_v12 = vsub.s32 %v2463_v4, %v2482_v23  ;;  %1950 = vpow2.f32 %v580_v57 }
  0x6e   : > { %v711_v9 = vand.u32 4294901760, %v2565_v5  ;;  %vm2601_vm2 = vcmp.le.u32.totalorder %v432_v6, 6  ;;  %v2605_v8 = vcvt.f32.s32 %v1868_v16  ;;  %vm2607_vm3 = vcmp.le.u32.totalorder %v485_v49, 6 }
  0x6f   : > { %v1447_v27 = vadd.f32 %v1446_v0, %v637_v7  ;;  %vm2611_vm4 = vcmp.le.u32.totalorder %v487_v12, 6  ;;  %v2615_v57 = vpop.eup %1946  ;;  %vm529_vm5 = vmand %vm2587_vm1, %vm2607_vm3  ;;  %1952 = vpow2.f32 %v584_v41  ;;  %v2621_v6 = vmul.u32 9, %v1861_v3  ;;  %v3612_v7 = vld [vmem:[#allocation6_spill] sm:$0xff] }
  0x70   : > { %3611 = vst [vmem:[#allocation22_spill] sm:$0xff] %v2615_v57  ;;  %v252_v61 = vsub.s32 %v2284_v36, %v2591_v19  ;;  %v406_v12 = vmul.u32 9, %v2605_v8  ;;  %v421_v0 = vsub.s32 %v2313_v63, %v2605_v8  ;;  %vm531_vm6 = vmand %vm2601_vm2, %vm2611_vm4  ;;  %v2634_v49 = vadd.s32 3, %v1859_v32 }
  0x71   : > { %v2636_v41 = vadd.s32 3, %v1861_v3  ;;  %v2638_v43 = vsub.f32 %v609_v21, %v703_v38  ;;  %v423_v36 = vsub.s32 %v2320_v15, %v2605_v8  ;;  %v3613_v19 = vand.u32 4294901760, %v2581_v31  ;;  %v2666_v38 = vpop.eup %1948 }
  0x72   : > { %v425_v63 = vsub.s32 %v2371_v35, %v2605_v8  ;;  %v2651_v59 = vsub.s32 %v2506_v26, %v406_v12  ;;  %v427_v32 = vsub.s32 %v2377_v22, %v2605_v8  ;;  %v2661_v15 = vsel %vm529_vm5, %v2545_v55, 0.0  ;;  %3614 = vst [vmem:[#allocation6_spill] sm:$0xff] %v2666_v38 }
  0x73   : > { %v2646_v16 = vpack.c.bf16 %v3613_v19, %v711_v9  ;;  %v2664_v21 = vsel %vm531_vm6, %v2615_v57, 0.0  ;;  %vm2668_vm7 = vcmp.le.u32.totalorder %v421_v0, 6  ;;  %v639_v22 = vmul.f32 %v2661_v15, %v2190_v10  ;;  %v3648_v57 = vld [vmem:[#allocation10_spill] sm:$0xff] }
  0x74   : > { %v641_v1 = vmul.f32 %v2664_v21, %v2193_v11  ;;  %v429_v26 = vsub.s32 %v2401_v46, %v2605_v8  ;;  %v476_v3 = vsub.s32 %v2365_v45, %v2651_v59  ;;  %v478_v2 = vsub.s32 %v2367_v53, %v2651_v59 }
  0x75   : > { %v480_v60 = vsub.s32 %v2379_v17, %v2651_v59  ;;  %v482_v12 = vsub.s32 %v2381_v56, %v2651_v59  ;;  %vm2686_vm8 = vcmp.le.u32.totalorder %v423_v36, 6  ;;  %vm2690_vm9 = vcmp.le.u32.totalorder %v425_v63, 6 }
  0x76   : > { %v1448_v46 = vadd.f32 %v1447_v27, %v639_v22  ;;  %v253_v45 = vsub.s32 %v2287_v37, %v2621_v6  ;;  %vm498_vm10 = vcmp.le.u32.totalorder %v476_v3, 6  ;;  %vm2696_vm11 = vcmp.le.u32.totalorder %v478_v2, 6 }
  0x77   : > { %vm2700_vm12 = vcmp.le.u32.totalorder %v427_v32, 6  ;;  %vm2704_vm13 = vcmp.le.u32.totalorder %v480_v60, 6  ;;  %v2708_v0 = vpop.eup %1950  ;;  %vm520_vm14 = vmand %vm2668_vm7, %vm498_vm10  ;;  %vm2712_vm15 = vcmp.le.u32.totalorder %v482_v12, 6  ;;  %v3512_v27 = vand.u32 4294901760, %v2661_v15 }
  0x78   : > { %3627 = vst [vmem:[#allocation23_spill] sm:$0xff] %v2708_v0  ;;  %v2717_v6 = vadd.f32 %v1448_v46, %v641_v1  ;;  %v431_v36 = vsub.s32 %v2403_v14, %v2605_v8  ;;  %vm522_vm1 = vmand %vm2686_vm8, %vm2696_vm11  ;;  %v2726_v19 = vsel %vm520_vm14, %v2567_v18, 0.0  ;;  %v3511_v63 = vand.u32 4294901760, %v2664_v21 }
  0x79   : > { %vm2729_vm2 = vcmp.le.u32.totalorder %v429_v26, 6  ;;  %v484_v35 = vsub.s32 %v2461_v20, %v2651_v59  ;;  %v2735_v22 = vpop.eup %1952  ;;  %v2738_v14 = vsel %vm522_vm1, %v2574_v25, 0.0  ;;  %v630_v1 = vmul.f32 %v2726_v19, %v2217_v24  ;;  %vm524_vm3 = vmand %vm2690_vm9, %vm2704_vm13 }
  0x7a   : > { %3632 = vst [vmem:[#allocation24_spill] sm:$0xff] %v2735_v22  ;;  %v3510_v3 = vand.u32 4294901760, %v2726_v19  ;;  %v486_v26 = vsub.s32 %v2463_v4, %v2651_v59  ;;  %v632_v20 = vmul.f32 %v2738_v14, %v2222_v28  ;;  %v3509_v2 = vand.u32 4294901760, %v2738_v14  ;;  %vm526_vm4 = vmand %vm2700_vm12, %vm2712_vm15 }
  0x7b   : > { %v2757_v24 = vsel %vm524_vm3, %v2583_v44, 0.0  ;;  %vm506_vm5 = vcmp.le.u32.totalorder %v484_v35, 6  ;;  %v2760_v60 = vsel %vm526_vm4, %v2666_v38, 0.0  ;;  %vm2765_vm6 = vcmp.le.u32.totalorder %v431_v36, 6 }
  0x7c   : > { %v634_v4 = vmul.f32 %v2757_v24, %v2225_v29  ;;  %v3508_v12 = vand.u32 4294901760, %v2757_v24  ;;  %vm528_vm7 = vmand %vm2729_vm2, %vm506_vm5  ;;  %v2775_v10 = vpack.c.bf16 %v3509_v2, %v3510_v3  ;;  %v1428_v11 = vadd.f32 %v632_v20, %v630_v1 }
  0x7d   : > { %v636_v46 = vmul.f32 %v2760_v60, %v2228_v30  ;;  %v2779_v29 = vadd.s32 3, %v252_v61  ;;  %v3507_v53 = vand.u32 4294901760, %v2760_v60  ;;  %vm508_vm8 = vcmp.le.u32.totalorder %v486_v26, 6 }
  0x7e   : > { %v2783_v17 = vsel %vm528_vm7, %v2708_v0, 0.0  ;;  %v2785_v56 = vadd.s32 3, %v253_v45  ;;  %1718 = vmatpush1.bf16.msra.mxu1 %v2775_v10  ;;  %1778 = vmatpush1.bf16.msra.mxu0 %v2775_v10  ;;  %v1429_v37 = vadd.f32 %v1428_v11, %v634_v4  ;;  %vm530_vm9 = vmand %vm2765_vm6, %vm508_vm8  ;;  %v434_v36 = vsub.s32 %v2634_v49, %v2467_v48 }
  0x7f   : > { %v638_v30 = vmul.f32 %v2783_v17, %v2235_v33  ;;  %v3514_v61 = vand.u32 4294901760, %v2783_v17  ;;  %1720 = vmatprep.subr.bf16.mxu1 %v2646_v16  ;;  %1780 = vmatprep.subr.bf16.mxu0 %v2646_v16  ;;  %v2802_v45 = vpack.c.bf16 %v3507_v53, %v3508_v12  ;;  %v2808_v33 = vpack.c.bf16 %v3511_v63, %v3512_v27  ;;  %v3636_v12 = vld [vmem:[#allocation7_spill] sm:$0xff] }
  0x80   : > { %v2811_v32 = vsel %vm530_vm9, %v2735_v22, 0.0  ;;  %v436_v35 = vsub.s32 %v2636_v41, %v2467_v48  ;;  %v1430_v1 = vadd.f32 %v1429_v37, %v636_v46  ;;  %v489_v4 = vsub.s32 %v2779_v29, %v2482_v23 }
  0x81   : > { %v640_v26 = vmul.f32 %v2811_v32, %v2238_v34  ;;  %v3513_v20 = vand.u32 4294901760, %v2811_v32  ;;  %v3635_v28 = vand.u32 4294901760, %v2548_v13  ;;  %v491_v53 = vsub.s32 %v2785_v56, %v2482_v23 }
  0x82   : > { %v557_v2 = vsub.f32 %v3636_v12, %v2311_v62  ;;  %v3637_v46 = vsub.f32 %v3612_v7, %v2311_v62  ;;  %v2835_v37 = vsub.f32 %v2565_v5, %v711_v9  ;;  %1722 = vmatpush1.bf16.msra.mxu1 %v2802_v45  ;;  %1782 = vmatpush1.bf16.msra.mxu0 %v2802_v45  ;;  %v3638_v3 = vcvt.s32.f32 %v2297_v47 }
  0x83   : > { %v2823_v11 = vsub.f32 %v2548_v13, %v3635_v28  ;;  %v2843_v13 = vpack.c.bf16 %v3513_v20, %v3514_v61  ;;  %v1431_v28 = vadd.f32 %v1430_v1, %v638_v30  ;;  %1724 = vmatprep.subr.bf16.mxu1 %v2808_v33  ;;  %1784 = vmatprep.subr.bf16.mxu0 %v2808_v33  ;;  %vm2849_vm10 = vcmp.le.u32.totalorder %v434_v36, 6 }
  0x84   : > { %v590_v34 = vmul.f32 1.442695, %v3637_v46  ;;  %v200_v63 = vadd.f32 0.5, %v3638_v3  ;;  %v594_v9 = vmul.f32 1.442695, %v557_v2  ;;  %vm2856_vm11 = vcmp.le.u32.totalorder %v436_v35, 6 }
  0x85   : > { %v210_v46 = vmul.f32 0.11111111, %v2459_v58  ;;  %v2854_v27 = vadd.f32 %v1431_v28, %v640_v26  ;;  %vm2860_vm12 = vcmp.le.u32.totalorder %v489_v4, 6  ;;  %vm2864_vm13 = vcmp.le.u32.totalorder %v491_v53, 6  ;;  %v3647_v28 = vld [vmem:[#allocation8_spill] sm:$0xff] }
  0x86   : > { %1954 = vpow2.f32 %v590_v34  ;;  %v433_v2 = vsub.s32 %v2634_v49, %v2605_v8  ;;  %v554_v58 = vsub.f32 %v2248_v39, %v2373_v54  ;;  %v556_v36 = vsub.f32 %v2251_v40, %v2373_v54  ;;  %1726 = vmatpush1.bf16.msra.mxu1 %v2843_v13  ;;  %1786 = vmatpush1.bf16.msra.mxu0 %v2843_v13  ;;  %vm533_vm14 = vmand %vm2849_vm10, %vm2860_vm12 }
  0x87   : > { %1956 = vpow2.f32 %v594_v9  ;;  %v435_v53 = vsub.s32 %v2636_v41, %v2605_v8  ;;  %v488_v35 = vsub.s32 %v2779_v29, %v2651_v59  ;;  %v490_v1 = vsub.s32 %v2785_v56, %v2651_v59  ;;  %vm535_vm3 = vmand %vm2856_vm11, %vm2864_vm13 }
  0x88   : > { %v211_v49 = vmul.f32 0.11111111, %v200_v63  ;;  %v588_v26 = vmul.f32 1.442695, %v554_v58  ;;  %v592_v4 = vmul.f32 1.442695, %v556_v36  ;;  %v221_v34 = vfloor.f32 %v210_v46 }
  0x89   : > { %v559_v9 = vsub.f32 %v3647_v28, %v2311_v62  ;;  %v561_v22 = vsub.f32 %v3648_v57, %v2311_v62  ;;  %v558_v41 = vsub.f32 %v2261_v50, %v2373_v54  ;;  %v560_v29 = vsub.f32 %v2264_v52, %v2373_v54 }
  0x8a   : > { %v222_v61 = vfloor.f32 %v211_v49  ;;  %1958 = vpow2.f32 %v588_v26  ;;  %v1862_v55 = vtrunc.f32 %v221_v34  ;;  %v190_v63 = vcvt.s32.f32 %v2304_v51  ;;  %v3075_v49 = vld [vmem:[%s2170_s24 + $0x90] sm:$0xff] }
  0x8b   : > { %v598_v56 = vmul.f32 1.442695, %v559_v9  ;;  %1960 = vpow2.f32 %v592_v4  ;;  %v602_v58 = vmul.f32 1.442695, %v561_v22  ;;  %v596_v36 = vmul.f32 1.442695, %v558_v41 }
  0x8c   : > { %v1864_v46 = vtrunc.f32 %v222_v61  ;;  %vm2895_vm15 = vcmp.le.u32.totalorder %v433_v2, 6  ;;  %vm2899_vm1 = vcmp.le.u32.totalorder %v435_v53, 6  ;;  %v1863_v52 = vcvt.f32.s32 %v1862_v55  ;;  %3681 = vst [vmem:[#allocation31_spill] sm:$0xff] %v3075_v49 }
  0x8d   : > { %1962 = vpow2.f32 %v598_v56  ;;  %vm2903_vm2 = vcmp.le.u32.totalorder %v488_v35, 6  ;;  %v600_v61 = vmul.f32 1.442695, %v560_v29  ;;  %vm2913_vm4 = vcmp.le.u32.totalorder %v490_v1, 6  ;;  %v3659_v29 = vld [vmem:[#allocation9_spill] sm:$0xff] }
  0x8e   : > { %v1865_v22 = vcvt.f32.s32 %v1864_v46  ;;  %1964 = vpow2.f32 %v602_v58  ;;  %v243_v55 = vmul.u32 9, %v1863_v52  ;;  %v418_v2 = vadd.s32 3, %v1863_v52  ;;  %vm532_vm5 = vmand %vm2895_vm15, %vm2903_vm2 }
  0x8f   : > { %v201_v53 = vadd.f32 0.5, %v190_v63  ;;  %1966 = vpow2.f32 %v596_v36  ;;  %v563_v56 = vsub.f32 %v3659_v29, %v2311_v62  ;;  %vm534_vm6 = vmand %vm2899_vm1, %vm2913_vm4  ;;  %v3678_v62 = vand.u32 4294901760, %v2661_v15 }
  0x90   : > { %v2907_v3 = vpop.eup %1954  ;;  %v244_v26 = vmul.u32 9, %v1865_v22  ;;  %v419_v4 = vadd.s32 3, %v1865_v22  ;;  %v254_v1 = vsub.s32 %v2292_v42, %v243_v55  ;;  %v438_v28 = vsub.s32 %v418_v2, %v2467_v48 }
  0x91   : > { %3655 = vst [vmem:[#allocation7_spill] sm:$0xff] %v2907_v3  ;;  %v2918_v35 = vsel %vm533_vm14, %v2907_v3, 0.0  ;;  %v2920_v34 = vpop.eup %1956  ;;  %1968 = vpow2.f32 %v600_v61  ;;  %v212_v36 = vmul.f32 0.11111111, %v201_v53  ;;  %v437_v61 = vsub.s32 %v418_v2, %v2605_v8 }
  0x92   : > { %3658 = vst [vmem:[#allocation8_spill] sm:$0xff] %v2920_v34  ;;  %v643_v30 = vmul.f32 %v2918_v35, %v3612_v7  ;;  %v3524_v20 = vand.u32 4294901760, %v2918_v35  ;;  %v2928_v9 = vsel %vm535_vm3, %v2920_v34, 0.0  ;;  %v255_v41 = vsub.s32 %v2297_v47, %v244_v26 }
  0x93   : > { %v645_v63 = vmul.f32 %v2928_v9, %v3636_v12  ;;  %v3523_v7 = vand.u32 4294901760, %v2928_v9  ;;  %v440_v42 = vsub.s32 %v419_v4, %v2467_v48  ;;  %v473_v47 = vadd.s32 3, %v254_v1  ;;  %v3660_v12 = vld [vmem:[#allocation11_spill] sm:$0xff] }
  0x94   : > { %v1450_v46 = vadd.f32 %v2717_v6, %v643_v30  ;;  %v474_v58 = vadd.s32 3, %v255_v41  ;;  %v562_v52 = vsub.f32 %v3660_v12, %v2373_v54  ;;  %v2948_v22 = vpop.eup %1958  ;;  %vm2956_vm7 = vcmp.le.u32.totalorder %v438_v28, 6 }
  0x95   : > { %3661 = vst [vmem:[#allocation10_spill] sm:$0xff] %v2948_v22  ;;  %v2954_v6 = vpack.c.bf16 %v3523_v7, %v3524_v20  ;;  %v2961_v55 = vpop.eup %1960  ;;  %v2964_v53 = vsel %vm532_vm5, %v2948_v22, 0.0  ;;  %v493_v26 = vsub.s32 %v473_v47, %v2482_v23  ;;  %v439_v1 = vsub.s32 %v419_v4, %v2605_v8 }
  0x96   : > { %v1451_v57 = vadd.f32 %v1450_v46, %v645_v63  ;;  %3664 = vst [vmem:[#allocation9_spill] sm:$0xff] %v2961_v55  ;;  %v495_v30 = vsub.s32 %v474_v58, %v2482_v23  ;;  %v2979_v2 = vsel %vm534_vm6, %v2961_v55, 0.0  ;;  %v642_v28 = vmul.f32 %v2964_v53, %v2248_v39 }
  0x97   : > { %v2969_v41 = vpop.eup %1962  ;;  %1728 = vmatprep.subr.bf16.mxu1 %v2954_v6  ;;  %1788 = vmatprep.subr.bf16.mxu0 %v2954_v6  ;;  %v3522_v29 = vand.u32 4294901760, %v2964_v53  ;;  %vm2984_vm8 = vcmp.le.u32.totalorder %v440_v42, 6  ;;  %v644_v46 = vmul.f32 %v2979_v2, %v2251_v40  ;;  %v3521_v50 = vand.u32 4294901760, %v2979_v2 }
  0x98   : > { %3665 = vst [vmem:[#allocation11_spill] sm:$0xff] %v2969_v41  ;;  %v2988_v63 = vpop.eup %1964  ;;  %vm515_vm9 = vcmp.le.u32.totalorder %v493_v26, 6  ;;  %vm517_vm10 = vcmp.le.u32.totalorder %v495_v30, 6  ;;  %v1433_v5 = vadd.f32 %v2854_v27, %v642_v28  ;;  %vm2996_vm12 = vcmp.le.u32.totalorder %v437_v61, 6  ;;  %v3023_v30 = vld [vmem:[%s2170_s24 + $0x88] sm:$0xff] }
  0x99   : > { %3668 = vst [vmem:[#allocation25_spill] sm:$0xff] %v2988_v63  ;;  %vm537_vm11 = vmand %vm2956_vm7, %vm515_vm9  ;;  %v492_v42 = vsub.s32 %v473_v47, %v2651_v59  ;;  %v494_v12 = vsub.s32 %v474_v58, %v2651_v59  ;;  %v3002_v40 = vpop.eup %1966  ;;  %v3008_v26 = vpack.c.bf16 %v3521_v50, %v3522_v29  ;;  %vm3015_vm14 = vcmp.le.u32.totalorder %v439_v1, 6  ;;  %v3033_v1 = vld [vmem:[%s2170_s24 + $0x98] sm:$0xff] }
  0x9a   : > { %3671 = vst [vmem:[#allocation26_spill] sm:$0xff] %v3002_v40  ;;  %vm539_vm13 = vmand %vm2984_vm8, %vm517_vm10  ;;  %v3013_v27 = vsel %vm537_vm11, %v2969_v41, 0.0  ;;  %v223_v47 = vfloor.f32 %v212_v36  ;;  %v1434_v58 = vadd.f32 %v1433_v5, %v644_v46  ;;  %v3677_v5 = vand.u32 4294901760, %v2581_v31  ;;  %v3174_v41 = vld [vmem:[%s2170_s24 + $0xa0] sm:$0x1] }
  0x9b   : > { %v3020_v61 = vsel %vm539_vm13, %v2988_v63, 0.0  ;;  %3674 = vst [vmem:[#allocation27_spill] sm:$0xff] %v3023_v30  ;;  %v647_v28 = vmul.f32 %v3023_v30, %v3013_v27  ;;  %v3028_v50 = vpop.eup %1968  ;;  %1730 = vmatpush1.bf16.msra.mxu1 %v3008_v26  ;;  %1790 = vmatpush1.bf16.msra.mxu0 %v3008_v26  ;;  %3676 = vst [vmem:[#allocation29_spill] sm:$0xff] %v3033_v1  ;;  %vm514_vm15 = vcmp.le.u32.totalorder %v492_v42, 6  ;;  %vm516_vm1 = vcmp.le.u32.totalorder %v494_v12, 6 }
  0x9c   : > { %3675 = vst [vmem:[#allocation28_spill] sm:$0xff] %v3028_v50  ;;  %v649_v36 = vmul.f32 %v3033_v1, %v3020_v61  ;;  %v3529_v46 = vand.u32 4294901760, %v3020_v61  ;;  %v3041_v29 = vsub.f32 %v2581_v31, %v3677_v5  ;;  %vm536_vm2 = vmand %vm2996_vm12, %vm514_vm15  ;;  %v1866_v20 = vtrunc.f32 %v223_v47 }
  0x9d   : > { %v1452_v7 = vadd.f32 %v1451_v57, %v647_v28  ;;  %v606_v4 = vmul.f32 1.442695, %v563_v56  ;;  %v3048_v54 = vsub.f32 %v2661_v15, %v3678_v62  ;;  %v3679_v42 = vand.u32 4294901760, %v3013_v27  ;;  %vm538_vm3 = vmand %vm3015_vm14, %vm516_vm1  ;;  %v3067_v62 = vld [vmem:[%s2170_s24 + $0x80] sm:$0xff]  ;;  %3698 = vst [vmem:[#allocation34_spill] sm:$0xff] %v3174_v41 }
  0x9e   : > { %v3059_v31 = vsel %vm536_vm2, %v3002_v40, 0.0  ;;  %v604_v57 = vmul.f32 1.442695, %v562_v52  ;;  %v3064_v56 = vsel %vm538_vm3, %v3028_v50, 0.0  ;;  %3680 = vst [vmem:[#allocation30_spill] sm:$0xff] %v3067_v62  ;;  %v1867_v28 = vcvt.f32.s32 %v1866_v20 }
  0x9f   : > { %v3054_v12 = vpack.c.bf16 %v3529_v46, %v3679_v42  ;;  %v3061_v39 = vadd.f32 %v1452_v7, %v649_v36  ;;  %v646_v15 = vmul.f32 %v3067_v62, %v3059_v31  ;;  %v648_v7 = vmul.f32 %v3075_v49, %v3064_v56 }
  0xa0   : > { %v3535_v52 = vand.u32 4294901760, %v3064_v56  ;;  %1970 = vpow2.f32 %v606_v4  ;;  %v3682_v36 = vand.u32 4294901760, %v2664_v21  ;;  %v3683_v46 = vand.u32 4294901760, %v2726_v19 }
  0xa1   : > { %1732 = vmatprep.subr.bf16.mxu1 %v3054_v12  ;;  %1792 = vmatprep.subr.bf16.mxu0 %v3054_v12  ;;  %v1435_v42 = vadd.f32 %v1434_v58, %v646_v15  ;;  %1972 = vpow2.f32 %v604_v57  ;;  %v3684_v1 = vand.u32 4294901760, %v3059_v31  ;;  %v245_v20 = vmul.u32 9, %v1867_v28 }
  0xa2   : > { %v3083_v5 = vsub.f32 %v2664_v21, %v3682_v36  ;;  %v3088_v47 = vsub.f32 %v2726_v19, %v3683_v46  ;;  %v420_v4 = vadd.s32 3, %v1867_v28  ;;  %v3533_v30 = vmov 0.0   ;;  %v3685_v46 = vld [vmem:[#allocation12_spill] sm:$0xff] }
  0xa3   : > { %v3094_v49 = vpack.c.bf16 %v3535_v52, %v3684_v1  ;;  %789 = vmatprep.mubr.f32.mxu1 %v3533_v30  ;;  %1186 = vmatprep.mubr.f32.mxu0 %v3533_v30  ;;  %v3098_v21 = vadd.f32 %v1435_v42, %v648_v7  ;;  %v803_v58 = vand.u32 4294901760, %v2638_v43  ;;  %v815_v19 = vand.u32 4294901760, %v2823_v11 }
  0xa4   : > { %v676_v57 = vcvt.s32.f32 %v3685_v46  ;;  %v256_v1 = vsub.s32 %v2304_v51, %v245_v20  ;;  %v442_v15 = vsub.s32 %v420_v4, %v2467_v48  ;;  %v441_v28 = vsub.s32 %v420_v4, %v2605_v8 }
  0xa5   : > { %1734 = vmatpush1.bf16.msra.mxu1 %v3094_v49  ;;  %1794 = vmatpush1.bf16.msra.mxu0 %v3094_v49  ;;  %v3686_v36 = vand.u32 4294901760, %v2738_v14  ;;  %v804_v42 = vsub.f32 %v2638_v43, %v803_v58  ;;  %v816_v30 = vsub.f32 %v2823_v11, %v815_v19  ;;  %v3687_v62 = vand.u32 4294901760, %v2757_v24 }
  0xa6   : > { %v677_v52 = vadd.f32 0.5, %v676_v57  ;;  %v3688_v51 = vand.u32 4294901760, %v2760_v60  ;;  %v475_v8 = vadd.s32 3, %v256_v1  ;;  %v1795_v20 = vpack.c.bf16 %v815_v19, %v803_v58 }
  0xa7   : > { %v3111_v7 = vsub.f32 %v2738_v14, %v3686_v36  ;;  %v3118_v63 = vsub.f32 %v2757_v24, %v3687_v62  ;;  %vm3125_vm4 = vcmp.le.u32.totalorder %v442_v15, 6  ;;  %v805_v4 = vand.u32 4294901760, %v804_v42 }
  0xa8   : > { %v3123_v48 = vsub.f32 %v2760_v60, %v3688_v51  ;;  %v817_v36 = vand.u32 4294901760, %v816_v30  ;;  %v678_v50 = vmul.f32 0.11111111, %v677_v52  ;;  %v497_v57 = vsub.s32 %v475_v8, %v2482_v23 }
  0xa9   : > { %vm3130_vm5 = vcmp.le.u32.totalorder %v441_v28, 6  ;;  %v496_v24 = vsub.s32 %v475_v8, %v2651_v59  ;;  %v809_v60 = vand.u32 4294901760, %v3088_v47  ;;  %v821_v58 = vand.u32 4294901760, %v3111_v7 }
  0xaa   : > { %v1735_v62 = vpack.c.bf16 %v817_v36, %v805_v4  ;;  %v679_v1 = vfloor.f32 %v678_v50  ;;  %v827_v19 = vand.u32 4294901760, %v2835_v37  ;;  %v3138_v15 = vpop.eup %1970  ;;  %vm519_vm6 = vcmp.le.u32.totalorder %v497_v57, 6  ;;  %v3163_v57 = vld [vmem:[%s2170_s24 + $0xa8] sm:$0x1] }
  0xab   : > { %3693 = vst [vmem:[#allocation12_spill] sm:$0xff] %v3138_v15  ;;  %vm3140_vm7 = vcmp.le.u32.totalorder %v496_v24, 6  ;;  %v810_v30 = vsub.f32 %v3088_v47, %v809_v60  ;;  %v839_v59 = vand.u32 4294901760, %v3041_v29  ;;  %v3146_v52 = vpop.eup %1972  ;;  %vm541_vm8 = vmand %vm3125_vm4, %vm519_vm6  ;;  %v822_v28 = vsub.f32 %v3111_v7, %v821_v58 }
  0xac   : > { %3696 = vst [vmem:[#allocation32_spill] sm:$0xff] %v3146_v52  ;;  %v1872_v50 = vtrunc.f32 %v679_v1  ;;  %v3151_v42 = vpack.c.bf16 %v821_v58, %v809_v60  ;;  %v828_v51 = vsub.f32 %v2835_v37, %v827_v19  ;;  %v629_v8 = vsel %vm541_vm8, %v3138_v15, 0.0  ;;  %vm540_vm9 = vmand %vm3130_vm5, %vm3140_vm7 }
  0xad   : > { %v811_v4 = vand.u32 4294901760, %v810_v30  ;;  %v840_v36 = vsub.f32 %v3041_v29, %v839_v59  ;;  %v3160_v14 = vpack.c.bf16 %v839_v59, %v827_v19  ;;  %3697 = vst [vmem:[#allocation33_spill] sm:$0xff] %v3163_v57  ;;  %v651_v24 = vmul.f32 %v3163_v57, %v629_v8 }
  0xae   : > { %v3167_v60 = vsel %vm265_vm0, %v629_v8, 0  ;;  %v628_v1 = vsel %vm540_vm9, %v3146_v52, 0.0  ;;  %v1873_v58 = vcvt.f32.s32 %v1872_v50  ;;  %v823_v59 = vand.u32 4294901760, %v822_v28 }
  0xaf   : > { %v3171_v23 = vand.u32 4294901760, %v3167_v60  ;;  %v650_v30 = vmul.f32 %v3174_v41, %v628_v1  ;;  %v3178_v19 = vsel %vm265_vm0, %v628_v1, 0  ;;  %v1454_v15 = vsel %vm265_vm0, %v651_v24, 0.0 }
  0xb0   : > { %v3182_v57 = vand.u32 4294901760, %v3178_v19  ;;  %v681_v8 = vmul.u32 9, %v1873_v58  ;;  %v1707_v40 = vadd.s32 4294967292, %v1873_v58  ;;  %v3186_v50 = vadd.f32 %v1454_v15, %v3061_v39 }
  0xb1   : > { %744 = vmatprep.subr.mxu1 %v3171_v23  ;;  %1141 = vmatprep.subr.mxu0 %v3171_v23  ;;  %v1437_v41 = vsel %vm265_vm0, %v650_v30, 0.0  ;;  %v3190_v52 = vpack.c.bf16 %v823_v59, %v811_v4  ;;  %v829_v1 = vand.u32 4294901760, %v828_v51  ;;  %v3700_v28 = vand.u32 4294901760, %v2783_v17 }
  0xb2   : > { %3699 = vst [vmem:[#allocation35_spill] sm:$0xff] %v3186_v50  ;;  %746 = vmatpush1.msra.mxu1 %v3182_v57  ;;  %v3199_v58 = vadd.f32 %v1437_v41, %v3098_v21  ;;  %1143 = vmatpush1.msra.mxu0 %v3182_v57  ;;  %v682_v39 = vsub.s32 %v3685_v46, %v681_v8  ;;  %v3702_v15 = vand.u32 4294901760, %v2811_v32  ;;  %v841_v51 = vand.u32 4294901760, %v840_v36 }
  0xb3   : > { %v3195_v24 = vsub.f32 %v2783_v17, %v3700_v28  ;;  %1736 = vmatprep.subr.bf16.mxu1 %v1735_v62  ;;  %1796 = vmatprep.subr.bf16.mxu0 %v1795_v20  ;;  %v833_v17 = vand.u32 4294901760, %v3118_v63  ;;  %v845_v30 = vand.u32 4294901760, %v3123_v48  ;;  %v3703_v28 = vld [vmem:[#allocation5_spill] sm:$0xff]  ;;  %v851_v21 = vand.u32 4294901760, %v3048_v54 }
  0xb4   : > { %3701 = vst [vmem:[#allocation36_spill] sm:$0xff] %v3199_v58  ;;  %v3206_v4 = vsub.f32 %v2811_v32, %v3702_v15  ;;  %v1708_v59 = vadd.s32 4294967292, %v682_v39  ;;  %vm689_vm10 = vcmp.eq.s32.totalorder %v3703_v28, 2  ;;  %v863_v41 = vand.u32 4294901760, %v3083_v5 }
  0xb5   : > { %v684_v46 = vcvt.s32.f32 %v1707_v40  ;;  %v3213_v8 = vpack.c.bf16 %v841_v51, %v829_v1  ;;  %v834_v32 = vsub.f32 %v3118_v63, %v833_v17  ;;  %v846_v62 = vsub.f32 %v3123_v48, %v845_v30 }
  0xb6   : > { %v686_v20 = vcvt.s32.f32 %v1708_v59  ;;  %vm688_vm11 = vcmp.eq.s32.totalorder %v3703_v28, 1  ;;  %v1801_v36 = vpack.c.bf16 %v845_v30, %v833_v17  ;;  %v852_v15 = vsub.f32 %v3048_v54, %v851_v21 }
  0xb7   : > { %vm687_vm12 = vcmp.eq.s32.totalorder %v3703_v28, 0  ;;  %v835_v39 = vand.u32 4294901760, %v834_v32  ;;  %v847_v50 = vand.u32 4294901760, %v846_v62  ;;  %v864_v58 = vsub.f32 %v3083_v5, %v863_v41 }
  0xb8   : > { %v690_v34 = vsel %vm689_vm10, %v686_v20, 0.0  ;;  %vm693_vm13 = vcmask 662528   ;;  %v853_v40 = vand.u32 4294901760, %v852_v15  ;;  %v1803_v1 = vpack.c.bf16 %v863_v41, %v851_v21 }
  0xb9   : > { %v3704_v51 = vand.u32 4294901760, %v2918_v35  ;;  %v691_v59 = vsel %vm688_vm11, %v684_v46, %v690_v34  ;;  %v1741_v3 = vpack.c.bf16 %v847_v50, %v835_v39  ;;  %v865_v17 = vand.u32 4294901760, %v864_v58 }
  0xba   : > { %v3705_v30 = vand.u32 4294901760, %v2928_v9  ;;  %v692_v32 = vsel %vm687_vm12, 1.0, %v691_v59  ;;  %v857_v62 = vand.u32 4294901760, %v3195_v24  ;;  %v869_v20 = vand.u32 4294901760, %v3206_v4 }
  0xbb   : > { %v3224_v55 = vsub.f32 %v2918_v35, %v3704_v51  ;;  %v695_v15 = vsel %vm693_vm13, %v692_v32, 0  ;;  %v1743_v21 = vpack.c.bf16 %v865_v17, %v853_v40  ;;  %v3706_v50 = vand.u32 4294901760, %v2964_v53 }
  0xbc   : > { %v3229_v28 = vsub.f32 %v2928_v9, %v3705_v30  ;;  %v3233_v41 = vand.u32 4294901760, %v695_v15  ;;  %v858_v35 = vsub.f32 %v3195_v24, %v857_v62  ;;  %v870_v34 = vsub.f32 %v3206_v4, %v869_v20 }
  0xbd   : > { %v3240_v58 = vsub.f32 %v2964_v53, %v3706_v50  ;;  %v3707_v9 = vand.u32 4294901760, %v2979_v2  ;;  %v1805_v39 = vpack.c.bf16 %v869_v20, %v857_v62  ;;  %v875_v51 = vand.u32 4294901760, %v3224_v55 }
  0xbe   : > { %v3249_v40 = vsub.f32 %v695_v15, %v3233_v41  ;;  %v859_v59 = vand.u32 4294901760, %v858_v35  ;;  %v871_v17 = vand.u32 4294901760, %v870_v34  ;;  %v887_v30 = vand.u32 4294901760, %v3229_v28 }
  0xbf   : > { %v3245_v46 = vsub.f32 %v2979_v2, %v3707_v9  ;;  %v3708_v32 = vand.u32 4294901760, %v3013_v27  ;;  %v3709_v50 = vand.u32 4294901760, %v3020_v61  ;;  %v3710_v15 = vand.u32 4294901760, %v3059_v31 }
  0xc0   : > { %v792_v62 = vand.u32 4294901760, %v3249_v40  ;;  %v1745_v20 = vpack.c.bf16 %v871_v17, %v859_v59  ;;  %v876_v34 = vsub.f32 %v3224_v55, %v875_v51  ;;  %v1807_v0 = vpack.c.bf16 %v887_v30, %v875_v51 }
  0xc1   : > { %v3255_v53 = vsub.f32 %v3013_v27, %v3708_v32  ;;  %v3260_v2 = vsub.f32 %v3020_v61, %v3709_v50  ;;  %v3266_v35 = vsub.f32 %v3059_v31, %v3710_v15  ;;  %v888_v27 = vsub.f32 %v3229_v28, %v887_v30 }
  0xc2   : > { %v793_v9 = vsub.f32 %v3249_v40, %v792_v62  ;;  %1190 = vmatmul.mubr.f32.vlgmr.msra.gmra.mrb[0].mxu0 %v792_v62  ;;  %v881_v32 = vand.u32 4294901760, %v3240_v58  ;;  %v893_v61 = vand.u32 4294901760, %v3245_v46  ;;  %v3711_v50 = vand.u32 4294901760, %v3064_v56 }
  0xc3   : > { %1798 = vmatpush1.bf16.msra.mxu0 %v3151_v42  ;;  %v899_v31 = vand.u32 4294901760, %v3255_v53  ;;  %v911_v62 = vand.u32 4294901760, %v3260_v2  ;;  %v3712_v15 = vmov 0.0   ;;  %v877_v22 = vand.u32 4294901760, %v876_v34 }
  0xc4   : > { %v3276_v59 = vsub.f32 %v3064_v56, %v3711_v50  ;;  %v794_v17 = vand.u32 4294901760, %v793_v9  ;;  %1800 = vmatprep.subr.bf16.mxu0 %v3160_v14  ;;  %1326 = vmatprep.mubr.f32.mxu0 %v3712_v15  ;;  %v889_v38 = vand.u32 4294901760, %v888_v27  ;;  %v882_v44 = vsub.f32 %v3240_v58, %v881_v32 }
  0xc5   : > { %v894_v56 = vsub.f32 %v3245_v46, %v893_v61  ;;  %v905_v50 = vand.u32 4294901760, %v3266_v35  ;;  %v900_v42 = vsub.f32 %v3255_v53, %v899_v31  ;;  %v1757_v9 = vpack.c.bf16 %v3111_v7, %v3088_v47 }
  0xc6   : > { %795 = vmatmul.mubr.f32.vlgmr.msra.gmra.mrb[0].mxu1 %v794_v17  ;;  %v917_v14 = vand.u32 4294901760, %v3276_v59  ;;  %v1759_v51 = vpack.c.bf16 %v3041_v29, %v2835_v37  ;;  %v912_v30 = vsub.f32 %v3260_v2, %v911_v62  ;;  %v3297_v34 = vsub.f32 %v3167_v60, %v3171_v23  ;;  %v1998_v17 = vld [vmem:[%s2170_s24 + $0x8] sm:$0xff] }
  0xc7   : > { %1738 = vmatpush1.bf16.msra.mxu1 %v3190_v52  ;;  %1802 = vmatpush1.bf16.msra.mxu0 %v1801_v36  ;;  %v1761_v52 = vpack.c.bf16 %v3123_v48, %v3118_v63  ;;  %v1763_v47 = vpack.c.bf16 %v3083_v5, %v3048_v54  ;;  %v1765_v37 = vpack.c.bf16 %v3206_v4, %v3195_v24  ;;  %v883_v7 = vand.u32 4294901760, %v882_v44 }
  0xc8   : > { %1740 = vmatprep.subr.bf16.mxu1 %v3213_v8  ;;  %1804 = vmatprep.subr.bf16.mxu0 %v1803_v1  ;;  %v3308_v29 = vsub.f32 %v3178_v19, %v3182_v57  ;;  %v895_v8 = vand.u32 4294901760, %v894_v56  ;;  %v1809_v36 = vpack.c.bf16 %v893_v61, %v881_v32  ;;  %v1747_v60 = vpack.c.bf16 %v889_v38, %v877_v22  ;;  %v3713_v61 = vld [vmem:[#allocation20_spill] sm:$0xff] }
  0xc9   : > { %975 = vmatprep.mubr.f32.mxu1 %v3712_v15  ;;  %v906_v63 = vsub.f32 %v3266_v35, %v905_v50  ;;  %v918_v48 = vsub.f32 %v3276_v59, %v917_v14  ;;  %v901_v54 = vand.u32 4294901760, %v900_v42  ;;  %v913_v5 = vand.u32 4294901760, %v912_v30 }
  0xca   : > { %v1811_v1 = vpack.c.bf16 %v911_v62, %v899_v31  ;;  %v923_v24 = vand.u32 4294901760, %v3297_v34  ;;  %v1749_v4 = vpack.c.bf16 %v895_v8, %v883_v7  ;;  %v1813_v27 = vpack.c.bf16 %v917_v14, %v905_v50  ;;  %v3722_v50 = vld [vmem:[#allocation24_spill] sm:$0xff]  ;;  %v2000_v14 = vld [vmem:[%s2170_s24 + $0x20] sm:$0xff] }
  0xcb   : > { %1742 = vmatpush1.bf16.msra.mxu1 %v1741_v3  ;;  %1806 = vmatpush1.bf16.msra.mxu0 %v1805_v39  ;;  %v907_v44 = vand.u32 4294901760, %v906_v63  ;;  %v919_v19 = vand.u32 4294901760, %v918_v48  ;;  %v929_v3 = vand.u32 4294901760, %v3308_v29  ;;  %v1751_v38 = vpack.c.bf16 %v913_v5, %v901_v54  ;;  %v2003_v63 = vld [vmem:[%s2170_s24 + $0x38] sm:$0xff]  ;;  %v3726_v5 = vld [vmem:[#allocation9_spill] sm:$0xff] }
  0xcc   : > { %1744 = vmatprep.subr.bf16.mxu1 %v1743_v21  ;;  %1808 = vmatprep.subr.bf16.mxu0 %v1807_v0  ;;  %v924_v22 = vsub.f32 %v3297_v34, %v923_v24  ;;  %v1755_v32 = vpack.c.bf16 %v2823_v11, %v2638_v43  ;;  %v1767_v43 = vpack.c.bf16 %v3229_v28, %v3224_v55  ;;  %v3714_v11 = vld [vmem:[#allocation15_spill] sm:$0xff]  ;;  %v3716_v55 = vld [vmem:[#allocation21_spill] sm:$0xff]  ;;  %v3719_v28 = vld [vmem:[#allocation18_spill] sm:$0xff]  ;;  %vm1596_vm14 = vcmask 1041408  }
  0xcd   : > { %v1753_v0 = vpack.c.bf16 %v919_v19, %v907_v44  ;;  %v930_v21 = vsub.f32 %v3308_v29, %v929_v3  ;;  %v653_v62 = vmul.f32 %v1998_v17, %v3714_v11  ;;  %v659_v48 = vmul.f32 %v2003_v63, %v3719_v28  ;;  %v3727_v19 = vld [vmem:[#allocation8_spill] sm:$0xff] }
  0xce   : > { %v925_v39 = vand.u32 4294901760, %v924_v22  ;;  %vm1599_vm15 = vcmask 1042432  }
  0xcf   : > { %1746 = vmatpush1.bf16.msra.mxu1 %v1745_v20  ;;  %1810 = vmatpush1.bf16.msra.mxu0 %v1809_v36  ;;  %v931_v20 = vand.u32 4294901760, %v930_v21  ;;  %v3725_v36 = vld [vmem:[#allocation7_spill] sm:$0xff] }
  0xd0   : > { %1748 = vmatprep.subr.bf16.mxu1 %v1747_v60  ;;  %1812 = vmatprep.subr.bf16.mxu0 %v1811_v1 }
  0xd3   : > { %1750 = vmatpush1.bf16.msra.mxu1 %v1749_v4  ;;  %1814 = vmatpush1.bf16.msra.mxu0 %v1813_v27 }
  0xd4   : > { %1752 = vmatprep.subr.bf16.mxu1 %v1751_v38  ;;  %1279 = vmatprep.subr.mxu0 %v923_v24  ;;  %v2004_v24 = vld [vmem:[%s2170_s24 + $0x40] sm:$0xff] }
  0xd7   : > { %1754 = vmatpush1.bf16.msra.mxu1 %v1753_v0  ;;  %1283 = vmatpush1.msra.mxu0 %v929_v3  ;;  %v2005_v3 = vld [vmem:[%s2170_s24 + $0x48] sm:$0xff]  ;;  %v3728_v0 = vld [vmem:[#allocation26_spill] sm:$0xff] }
  0xd8   : > { %926 = vmatprep.subr.mxu1 %v925_v39  ;;  %1816 = vmatprep.subr.bf16.mxu0 %v3713_v61  ;;  %v3729_v61 = vld [vmem:[#allocation11_spill] sm:$0xff] }
  0xd9   : > { %1328 = vmatmul.mubr.f32.vlgmr.msra.gmra.mrb[0].mxu0 %v3233_v41 }
  0xda   : > { %1818 = vmatpush1.bf16.msra.mxu0 %v2775_v10  ;;  %1420 = vmatprep.mubr.f32.mxu0 %v3712_v15  ;;  %v1771_v10 = vpack.c.bf16 %v3260_v2, %v3255_v53  ;;  %v1996_v53 = vld [vmem:[%s2170_s24] sm:$0xff]  ;;  %v1997_v2 = vld [vmem:[%s2170_s24 + $0x10] sm:$0xff] }
  0xdb   : > { %932 = vmatpush1.msra.mxu1 %v931_v20  ;;  %1820 = vmatprep.subr.bf16.mxu0 %v2646_v16  ;;  %v1769_v16 = vpack.c.bf16 %v3245_v46, %v3240_v58  ;;  %v3720_v58 = vld [vmem:[#allocation23_spill] sm:$0xff]  ;;  %v2006_v20 = vld [vmem:[%s2170_s24 + $0x50] sm:$0xff] }
  0xdc   : > { %1756 = vmatprep.subr.bf16.mxu1 %v1755_v32  ;;  %977 = vmatmul.mubr.f32.vlgmr.msra.gmra.mrb[0].mxu1 %v3233_v41  ;;  %v660_v4 = vmul.f32 %v2004_v24, %v3720_v58  ;;  %v662_v32 = vmul.f32 %v2006_v20, %v3722_v50 }
  0xdd   : > { %1758 = vmatpush1.bf16.msra.mxu1 %v1757_v9  ;;  %1091 = vmatprep.mubr.f32.mxu1 %v3712_v15  ;;  %v1999_v15 = vld [vmem:[%s2170_s24 + $0x18] sm:$0xff]  ;;  %v656_v9 = vmul.f32 %v2000_v14, %v3716_v55 }
  0xde   : > { %1760 = vmatprep.subr.bf16.mxu1 %v1759_v51  ;;  %1822 = vmatpush1.bf16.msra.mxu0 %v2802_v45  ;;  %v1773_v45 = vpack.c.bf16 %v3276_v59, %v3266_v35  ;;  %v654_v35 = vmul.f32 %v1997_v2, %v2574_v25  ;;  %v3721_v59 = vld [vmem:[#allocation19_spill] sm:$0xff]  ;;  %v3723_v51 = vld [vmem:[#allocation22_spill] sm:$0xff] }
  0xdf   : > { %1824 = vmatprep.subr.bf16.mxu0 %v2808_v33  ;;  %v1462_v33 = vadd.f32 %v2574_v25, %v2567_v18  ;;  %v661_v38 = vmul.f32 %v2005_v3, %v3721_v59 }
  0xe1   : > { %1762 = vmatpush1.bf16.msra.mxu1 %v1761_v52 }
  0xe2   : > { %1764 = vmatprep.subr.bf16.mxu1 %v1763_v47  ;;  %1826 = vmatpush1.bf16.msra.mxu0 %v2843_v13  ;;  %v3715_v13 = vld [vmem:[#allocation16_spill] sm:$0xff]  ;;  %v3724_v47 = vld [vmem:[#allocation10_spill] sm:$0xff] }
  0xe3   : > { %1828 = vmatprep.subr.bf16.mxu0 %v2954_v6  ;;  %v1479_v6 = vadd.f32 %v3715_v13, %v3714_v11  ;;  %v655_v56 = vmul.f32 %v1999_v15, %v3715_v13  ;;  %v3731_v13 = vld [vmem:[#allocation32_spill] sm:$0xff] }
  0xe5   : > { %1766 = vmatpush1.bf16.msra.mxu1 %v1765_v37  ;;  %v1513_v52 = vadd.f32 %v655_v56, %v653_v62  ;;  %v3734_v56 = vld [vmem:[#allocation30_spill] sm:$0xff] }
  0xe6   : > { %1768 = vmatprep.subr.bf16.mxu1 %v1767_v43  ;;  %1830 = vmatpush1.bf16.msra.mxu0 %v3008_v26  ;;  %v1463_v26 = vadd.f32 %v3716_v55, %v1462_v33  ;;  %v3730_v33 = vld [vmem:[#allocation28_spill] sm:$0xff]  ;;  %v2008_v55 = vld [vmem:[%s2170_s24 + $0x60] sm:$0xff] }
  0xe7   : > { %1832 = vmatprep.subr.bf16.mxu0 %v3054_v12  ;;  %v3717_v12 = vld [vmem:[#allocation17_spill] sm:$0xff] }
  0xe9   : > { %1770 = vmatpush1.bf16.msra.mxu1 %v1769_v16 }
  0xea   : > { %1772 = vmatprep.subr.bf16.mxu1 %v1771_v10  ;;  %1834 = vmatpush1.bf16.msra.mxu0 %v3094_v49  ;;  %v1480_v49 = vadd.f32 %v3717_v12, %v1479_v6  ;;  %v2007_v10 = vld [vmem:[%s2170_s24 + $0x58] sm:$0xff]  ;;  %v1471_v6 = vsel %vm265_vm0, %v3731_v13, 0.0 }
  0xeb   : > { %1375 = vmatprep.subr.mxu0 %v3171_v23 }
  0xed   : > { %1774 = vmatpush1.bf16.msra.mxu1 %v1773_v45  ;;  %v663_v45 = vmul.f32 %v2007_v10, %v3723_v51 }
  0xee   : > { %1045 = vmatprep.subr.mxu1 %v3297_v34  ;;  %1377 = vmatpush1.msra.mxu0 %v3182_v57  ;;  %v3718_v57 = vld [vmem:[#allocation6_spill] sm:$0xff]  ;;  %v2001_v34 = vld [vmem:[%s2170_s24 + $0x28] sm:$0xff] }
  0xef   : > { %1422 = vmatmul.mubr.f32.vlgmr.msra.gmra.mrb[0].mxu0 %v3233_v41  ;;  %v1464_v23 = vadd.f32 %v3718_v57, %v1463_v26  ;;  %v1481_v41 = vadd.f32 %v3719_v28, %v1480_v49  ;;  %v657_v25 = vmul.f32 %v2001_v34, %v3717_v12  ;;  %v664_v26 = vmul.f32 %v2008_v55, %v3724_v47  ;;  %v3732_v12 = vld [vmem:[#allocation25_spill] sm:$0xff]  ;;  %v3736_v34 = vld [vmem:[#allocation31_spill] sm:$0xff] }
  0xf1   : > { %1048 = vmatpush1.msra.mxu1 %v3308_v29  ;;  %v1465_v46 = vadd.f32 %v3720_v58, %v1464_v23  ;;  %v1482_v31 = vadd.f32 %v3721_v59, %v1481_v41  ;;  %v2002_v29 = vld [vmem:[%s2170_s24 + $0x30] sm:$0xff]  ;;  %v1514_v54 = vadd.f32 %v1513_v52, %v657_v25  ;;  %v2009_v23 = vld [vmem:[%s2170_s24 + $0x68] sm:$0xff]  ;;  %v670_v25 = vmul.f32 %v3736_v34, %v3730_v33  ;;  %v3742_v34 = vld [vmem:[#allocation14_spill] sm:$0xff] }
  0xf2   : > { %1094 = vmatmul.mubr.f32.vlgmr.msra.gmra.mrb[0].mxu1 %v3249_v40  ;;  %v652_v40 = vmul.f32 %v1996_v53, %v2567_v18  ;;  %v658_v7 = vmul.f32 %v2002_v29, %v3718_v57  ;;  %v665_v28 = vmul.f32 %v2009_v23, %v3725_v36  ;;  %v3733_v41 = vld [vmem:[#allocation12_spill] sm:$0xff] }
  0xf3   : > { %v1466_v42 = vadd.f32 %v3722_v50, %v1465_v46  ;;  %v1483_v30 = vadd.f32 %v3723_v51, %v1482_v31  ;;  %v1515_v22 = vadd.f32 %v1514_v54, %v659_v48  ;;  %v1488_v58 = vsel %vm265_vm0, %v3733_v41, 0.0  ;;  %v2011_v31 = vld [vmem:[%s2170_s24 + $0x78] sm:$0xff] }
  0xf4   : > { %v1496_v18 = vadd.f32 %v654_v35, %v652_v40  ;;  %v2010_v40 = vld [vmem:[%s2170_s24 + $0x70] sm:$0xff]  ;;  %v667_v17 = vmul.f32 %v2011_v31, %v3727_v19  ;;  %v668_v50 = vmul.f32 %v3734_v56, %v3728_v0 }
  0xf5   : > { %v1467_v37 = vadd.f32 %v3724_v47, %v1466_v42  ;;  %v1484_v60 = vadd.f32 %v3725_v36, %v1483_v30  ;;  %v1516_v16 = vadd.f32 %v1515_v22, %v661_v38  ;;  %v666_v2 = vmul.f32 %v2010_v40, %v3726_v5  ;;  %v3740_v22 = vld [vmem:[#allocation36_spill] sm:$0xff] }
  0xf6   : > { %v1497_v8 = vadd.f32 %v1496_v18, %v656_v9  ;;  %v3735_v9 = vld [vmem:[#allocation27_spill] sm:$0xff] }
  0xf7   : > { %v1468_v1 = vadd.f32 %v3726_v5, %v1467_v37  ;;  %v1485_v27 = vadd.f32 %v3727_v19, %v1484_v60  ;;  %v1517_v46 = vadd.f32 %v1516_v16, %v663_v45  ;;  %v669_v18 = vmul.f32 %v3735_v9, %v3729_v61  ;;  %v3737_v37 = vld [vmem:[#allocation29_spill] sm:$0xff] }
  0xf8   : > { %v1498_v44 = vadd.f32 %v1497_v8, %v658_v7  ;;  %v671_v29 = vmul.f32 %v3737_v37, %v3732_v12  ;;  %v3738_v7 = vld [vmem:[#allocation34_spill] sm:$0xff]  ;;  %v3739_v60 = vld [vmem:[#allocation33_spill] sm:$0xff] }
  0xf9   : > { %v1469_v21 = vadd.f32 %v3728_v0, %v1468_v1  ;;  %v1486_v43 = vadd.f32 %v3729_v61, %v1485_v27  ;;  %v1518_v62 = vadd.f32 %v1517_v46, %v665_v28  ;;  %v672_v8 = vmul.f32 %v3738_v7, %v3731_v13  ;;  %v3741_v61 = vld [vmem:[#allocation35_spill] sm:$0xff] }
  0xfa   : > { %v1499_v39 = vadd.f32 %v1498_v44, %v660_v4  ;;  %v673_v63 = vmul.f32 %v3739_v60, %v3733_v41  ;;  %v1439_v0 = vrot.slane %v3740_v22, 4  ;;  %v3743_v60 = vld [vmem:[#allocation13_spill] sm:$0xff] }
  0xfb   : > { %v1470_v11 = vadd.f32 %v3730_v33, %v1469_v21  ;;  %v1487_v49 = vadd.f32 %v3732_v12, %v1486_v43  ;;  %v1519_v51 = vadd.f32 %v1518_v62, %v667_v17  ;;  %v1505_v1 = vsel %vm265_vm0, %v672_v8, 0.0 }
  0xfc   : > { %v1500_v57 = vadd.f32 %v1499_v39, %v662_v32  ;;  %v1522_v44 = vsel %vm265_vm0, %v673_v63, 0.0  ;;  %v1456_v43 = vrot.slane %v3741_v61, 4  ;;  %v1440_v16 = vadd.f32 %v1439_v0, %v3740_v22 }
  0xfd   : > { %v1472_v53 = vadd.f32 %v1471_v6, %v1470_v11  ;;  %v1489_v35 = vadd.f32 %v1488_v58, %v1487_v49  ;;  %v1520_v36 = vadd.f32 %v1519_v51, %v669_v18 }
  0xfe   : > { %v1501_v59 = vadd.f32 %v1500_v57, %v664_v26  ;;  %v1457_v11 = vadd.f32 %v1456_v43, %v3741_v61  ;;  %v1441_v6 = vrot.slane %v1440_v16, 2 }
  0xff   : > { %v1473_v15 = vrot.slane %v1472_v53, 4  ;;  %v1490_v42 = vrot.slane %v1489_v35, 4  ;;  %v1521_v24 = vadd.f32 %v1520_v36, %v671_v29 }
 0x100   : > { %v1502_v14 = vadd.f32 %v1501_v59, %v666_v2  ;;  %v1458_v57 = vrot.slane %v1457_v11, 2  ;;  %v1442_v41 = vadd.f32 %v1441_v6, %v1440_v16 }
 0x101   : > { %v1474_v30 = vadd.f32 %v1473_v15, %v1472_v53  ;;  %v1491_v52 = vadd.f32 %v1490_v42, %v1489_v35  ;;  %v1523_v3 = vadd.f32 %v1522_v44, %v1521_v24 }
 0x102   : > { %v1503_v47 = vadd.f32 %v1502_v14, %v668_v50  ;;  %v1459_v40 = vadd.f32 %v1458_v57, %v1457_v11  ;;  %v1443_v35 = vrot.slane %v1442_v41, 1 }
 0x103   : > { %v1475_v48 = vrot.slane %v1474_v30, 2  ;;  %v1492_v54 = vrot.slane %v1491_v52, 2  ;;  %v1524_v20 = vrot.slane %v1523_v3, 4 }
 0x104   : > { %v1504_v5 = vadd.f32 %v1503_v47, %v670_v25  ;;  %v1460_v62 = vrot.slane %v1459_v40, 1  ;;  %v1444_v56 = vadd.f32 %v1443_v35, %v1442_v41 }
 0x105   : > { %v1476_v4 = vadd.f32 %v1475_v48, %v1474_v30  ;;  %v1493_v19 = vadd.f32 %v1492_v54, %v1491_v52  ;;  %v1525_v33 = vadd.f32 %v1524_v20, %v1523_v3 }
 0x106   : > { %v1506_v27 = vadd.f32 %v1505_v1, %v1504_v5  ;;  %v1461_v30 = vadd.f32 %v1460_v62, %v1459_v40 }
 0x107   : > { %v1477_v38 = vrot.slane %v1476_v4, 1  ;;  %v1494_v21 = vrot.slane %v1493_v19, 1  ;;  %v1526_v12 = vrot.slane %v1525_v33, 2 }
 0x108   : > { %v1507_v39 = vrot.slane %v1506_v27, 4 }
 0x109   : > { %v1478_v32 = vadd.f32 %v1477_v38, %v1476_v4  ;;  %v1495_v10 = vadd.f32 %v1494_v21, %v1493_v19  ;;  %v1527_v53 = vadd.f32 %v1526_v12, %v1525_v33 }
 0x10a   : > { %v1508_v45 = vadd.f32 %v1507_v39, %v1506_v27 }
 0x10b   : > { %1974 = vlog2.f32 %v1478_v32  ;;  %v1528_v31 = vrot.slane %v1527_v53, 1 }
 0x10c   : > { %v1509_v26 = vrot.slane %v1508_v45, 2  ;;  %1976 = vlog2.f32 %v1495_v10 }
 0x10d   : > { %1978 = vrcp.f32 %v1478_v32  ;;  %v1529_v14 = vadd.f32 %v1528_v31, %v1527_v53 }
 0x10e   : > { %v1510_v46 = vadd.f32 %v1509_v26, %v1508_v45  ;;  %1980 = vrcp.f32 %v1495_v10 }
 0x110   : > { %v1511_v59 = vrot.slane %v1510_v46, 1 }
 0x112   : > { %v1512_v50 = vadd.f32 %v1511_v59, %v1510_v46 }
 0x115   : > { %v1975_v2 = vpop.eup %1974 }
 0x116   : > { %v1977_v17 = vpop.eup %1976  ;;  %v1551_v15 = vmul.f32 0.6931472, %v1975_v2 }
 0x117   : > { %v1979_v42 = vpop.eup %1978  ;;  %v1553_v9 = vmul.f32 0.6931472, %v1977_v17 }
 0x118   : > { %v1981_v18 = vpop.eup %1980  ;;  %v1554_v25 = vadd.f32 %v1551_v15, %v3742_v34  ;;  %v1556_v7 = vmul.f32 %v1979_v42, %v1512_v50 }
 0x119   : > { %v1555_v63 = vadd.f32 %v1553_v9, %v3743_v60  ;;  %v1557_v48 = vmul.f32 %v1981_v18, %v1529_v14 }
 0x11a   : > { %v1558_v22 = vsub.f32 %v1554_v25, %v1556_v7 }
 0x11b   : > { %v1559_v32 = vsub.f32 %v1555_v63, %v1557_v48 }
 0x11c   : > { %v1560_v45 = vmul.f32 0.2275598, %v1558_v22 }
 0x1c2   : > { %v1423_v13 = vpop.f32.mrb[0].mxu0 }
 0x1c3   : > { %v1425_v55 = vpop.f32.mrb[1].mxu0 }
 0x1c5   : > { %v1095_v49 = vpop.f32.mrb[0].mxu1 }
 0x1c6   : > { %v1835_v23 = vadd.f32 %v1423_v13, %v1095_v49  ;;  %v1097_v28 = vpop.f32.mrb[1].mxu1  ;;  %v1561_v13 = vmul.f32 0.2275598, %v1559_v32 }
 0x1c7   : > { %v1836_v58 = vadd.f32 %v1425_v55, %v1097_v28 }
 0x1c8   : > { %1982 = vrcp.f32 %v1835_v23 }
 0x1c9   : > { %1984 = vlog2.f32 %v1835_v23 }
 0x1ca   : > { %1986 = vrcp.f32 %v1836_v58 }
 0x1cb   : > { %1988 = vlog2.f32 %v1836_v58 }
 0x1d2   : > { %v1983_v51 = vpop.eup %1982 }
 0x1d3   : > { %v1985_v52 = vpop.eup %1984  ;;  %v1564_v47 = vrot.slane %v1983_v51, 7  ;;  %v1570_v37 = vrot.slane %v1983_v51, 6  ;;  %v1544_v29 = vmul.f32 %v1983_v51, %v1444_v56 }
 0x1d4   : > { %v1987_v8 = vpop.eup %1986  ;;  %v1539_v36 = vmul.f32 0.6931472, %v1985_v52 }
 0x1d5   : > { %v1989_v54 = vpop.eup %1988  ;;  %v1568_v5 = vmul.f32 %v1835_v23, %v1564_v47  ;;  %v1574_v1 = vmul.f32 %v1835_v23, %v1570_v37  ;;  %v1565_v24 = vrot.slane %v1987_v8, 7  ;;  %v1571_v4 = vrot.slane %v1987_v8, 6 }
 0x1d6   : > { %v1542_v44 = vadd.f32 %v1539_v36, %v3742_v34  ;;  %v1541_v19 = vmul.f32 0.6931472, %v1989_v54  ;;  %v1545_v27 = vmul.f32 %v1987_v8, %v1461_v30 }
 0x1d7   : > { %v1569_v3 = vmul.f32 %v1836_v58, %v1565_v24  ;;  %v1575_v38 = vmul.f32 %v1836_v58, %v1571_v4  ;;  %v1578_v39 = vrot.slane %v1568_v5, 1  ;;  %v1584_v20 = vrot.slane %v1574_v1, 1 }
 0x1d8   : > { %v1543_v0 = vadd.f32 %v1541_v19, %v3743_v60  ;;  %v1546_v21 = vsub.f32 %v1542_v44, %v1544_v29 }
 0x1d9   : > { %v1579_v16 = vrot.slane %v1569_v3, 1  ;;  %v1585_v10 = vrot.slane %v1575_v38, 1  ;;  %v1594_v6 = vsel %vm265_vm0, %v1578_v39, %v1584_v20 }
 0x1da   : > { %v1547_v61 = vsub.f32 %v1543_v0, %v1545_v27  ;;  %v1548_v43 = vmul.f32 0.25694916, %v1546_v21 }
 0x1db   : > { %v1595_v12 = vsel %vm265_vm0, %v1579_v16, %v1585_v10 }
 0x1dc   : > { %v1549_v33 = vmul.f32 0.25694916, %v1547_v61  ;;  %v1590_v11 = vrot.slane %v1548_v43, 6 }
 0x1de   : > { %v1591_v55 = vrot.slane %v1549_v33, 6  ;;  %v1597_v26 = vsel %vm1596_vm14, %v1594_v6, %v1590_v11 }
 0x1df   : > { %v1600_v49 = vsel %vm1599_vm15, %v1597_v26, %v1560_v45 }
 0x1e0   : > { %v1598_v57 = vsel %vm1596_vm14, %v1595_v12, %v1591_v55 }
 0x1e1   : > { %v1601_v23 = vsel %vm1599_vm15, %v1598_v57, %v1561_v13 }
 0x1e2   : > { %v1604_v28 = vcombine.low %v1600_v49, %v1601_v23 }
 0x1e4   : > { %1606 = vst [vmem:[%s134_s28] sm:$0xff] %v1604_v28 }
 0x1e5   : > { %2025 = shalt.err (!%p2022_p5)
}
 0x1e6   : > { %s2026_s15 = scalar_lea.hbm %s3433_s3, 128  ;;  %s2030_s21 = scalar_lea.hbm %s3483_s1, 256 }
 0x1e7   : > { %p2027_p6 = scmp.ne.s32.totalorder %s3433_s3, %s2026_s15  ;;  %p2031_p10 = scmp.lt.u32.totalorder %s3433_s3, %s3483_s1 }
 0x1e8   : > { %p2032_p11 = scmp.lt.u32.totalorder %s2030_s21, %s2026_s15  ;;  %p2034_p13 = scmp.lt.u32.totalorder %s2026_s15, %s3433_s3 }
 0x1e9   : > { %p2028_p7 = pnand %p2027_p6, %p2144_p4 }
 0x1ea   : > { %p2033_p12 = por %p2032_p11, %p2031_p10 }
 0x1eb   : > { %p2029_p9 = pneg %p2028_p7 }
 0x1ec   : > { %p2035_p0 = por %p2034_p13, %p2033_p12 }
 0x1ee   : > { %p2036_p1 = pnand %p2035_p0, %p2029_p9 }
 0x1f0   : > { %2039 = shalt.err (!%p2036_p1)
}
 0x1f1   : > { %1874 = dma.vmem_to_hbm [thread:$0]  (%p2144_p4), %s3435_s29, 128, %s3433_s3, %s1608_s4  }
 0x1f2 PF: > { %p1880_p2 = scmp.ge.s32.totalorder %s2090_s11, 2  ;;  %s1636_s24 = sand.u32 1, %s2070_s6  }
 0x1f3   : > { %s1637_s25 = scalar_lea.sflag [#allocation3], %s1636_s24 }
 0x1f4   : > { %p1877_p3 = pnand %p1880_p2, %p2151_p8 }
 0x1f6   : > { %2065 = dma.done.wait (!%p1877_p3), %s1637_s25, 128  }
 0x1f7   : > { %2067 = vsyncadd (!%p1877_p3), %s1637_s25, 4294967168  ;;  %s14_s11 = sadd.s32 1, %s2090_s11   ;;  %s3744_s6 = smov %s2074_s7 }
 0x1f8   : > { %p11_p5 = scmp.ge.s32.totalorder %s14_s11, 4   ;;  %s3745_s7 = smov %s2078_s8 }
 0x1f9   : > { %s3746_s8 = smov %s2157_s19  ;;  %s3747_s9 = smov %s2086_s10 }
 0x1fa   : > { %s3748_s10 = smov %s3750_s14  ;;  %13 = sbr.rel (!%p11_p5) target bundleno = 4 (0x4), region = 59 }
 0x201   :  { %1642 = vsyncpa [#allocation3], 1 }
 0x202   :  { %1644 = vsyncpa [#allocation3 + $0x1], 1 }

</bundles_post_ra>
